<compile_context>
chip_gen: v7x
topology: tpu7x:2x2x1
jax: 0.10.0
libtpu: 0.0.40
codegen_flags: <defaults>
</compile_context>

<pallas_src>
import functools

import jax
import jax.numpy as jnp
from jax.experimental import pallas as pl
from jax.experimental.pallas import tpu as pltpu


def _soft_label_estimate(feats, protos, n_ways):
    """Softmax(-squared-euclidean-distance) label expectation.

    feats : (..., W, S, D) float32 features
    protos: (..., W, D)    float32 per-way prototypes (same leading dims)
    returns (..., W, S) float32: sum_v v * softmax_v(-||feat - proto_v||^2)
    """

    def way_logit(v):
        pv = protos[..., v:v + 1, :]            # (..., 1, D)   static sublane slice
        pv = jnp.expand_dims(pv, axis=-3)       # (..., 1, 1, D) layout no-op
        d = feats - pv                          # (..., W, S, D)
        return -jnp.sum(d * d, axis=-1)         # (..., W, S)  squared euclidean

    # Online max-shifted softmax accumulation over the (small, static) way axis.
    m = way_logit(0)                            # running max of logits
    se = jnp.ones_like(m)                       # running sum of exp
    swe = jnp.zeros_like(m)                     # running sum of label * exp
    for v in range(1, n_ways):
        l_v = way_logit(v)
        m_new = jnp.maximum(m, l_v)
        alpha = jnp.exp(m - m_new)
        p = jnp.exp(l_v - m_new)
        se = alpha * se + p
        swe = alpha * swe + p * jnp.float32(v)
        m = m_new
    return swe / se


def _metric_noise_kernel(x_ref, y_ref, o_ref, soft_ref, acc_ref, *, w, n_ways):
    g = pl.program_id(0)

    # ---- Hoisted original-side work: runs once, result kept in VMEM scratch. ----
    @pl.when(g == 0)
    def _():
        acc_ref[...] = jnp.zeros_like(acc_ref)
        x = x_ref[...].astype(jnp.float32)                      # (W, S, D)
        proto = jnp.mean(x, axis=1)                             # (W, D)
        soft_ref[...] = _soft_label_estimate(x, proto, n_ways)  # (W, S)

    # ---- Streamed noise samples: TR per grid step. ----
    y = y_ref[...].astype(jnp.float32)                          # (TR, W, S, D)
    nproto = jnp.mean(y, axis=2)                                # (TR, W, D)
    nsoft = _soft_label_estimate(y, nproto, n_ways)             # (TR, W, S)

    diff = nsoft - soft_ref[...]                                # (TR, W, S)
    acc_ref[...] = acc_ref[...] + jnp.sum(diff * diff)          # scalar broadcast add

    # ---- Finalize: single output write, scaled by w. ----
    @pl.when(g == pl.num_programs(0) - 1)
    def _():
        o_ref[...] = acc_ref[...] * jnp.float32(w)


def metric_noise_loss(original_output, noise_output, n_shots, n_ways, random_times,
                      w=1.0, *, max_samples_per_step=None):
    """Pallas TPU implementation of MetricNoiseLoss.forward. Returns a scalar f32."""
    n_ways = int(n_ways)
    n_shots = int(n_shots)
    random_times = int(random_times)
    feat_dim = int(original_output.shape[-1])

    x = jnp.reshape(original_output, (n_ways, n_shots, feat_dim))
    y = jnp.reshape(noise_output, (random_times, n_ways, n_shots, feat_dim))

    # How many noise samples per grid step: target ~2 MiB noise tiles so the DMA
    # is fat enough to hit the HBM roofline but double-buffered tiles still fit
    # the scoped VMEM budget on every generation (incl. v7x's 64 MiB VMEM).
    per_sample_bytes = n_ways * n_shots * feat_dim * jnp.dtype(y.dtype).itemsize
    if max_samples_per_step is None:
        tr = (2 * 1024 * 1024) // max(per_sample_bytes, 1)
        tr = int(max(1, min(random_times, tr)))
    else:
        tr = int(max(1, min(random_times, max_samples_per_step)))

    n_steps = -(-random_times // tr)            # ceil div
    r_pad = n_steps * tr
    if r_pad != random_times:
        # Pad with copies of the original features: padded samples reproduce the
        # original soft estimate exactly, so they contribute zero to the loss.
        pad = jnp.broadcast_to(
            x[None].astype(y.dtype), (r_pad - random_times, n_ways, n_shots, feat_dim))
        y = jnp.concatenate([y, pad], axis=0)

    kernel = functools.partial(_metric_noise_kernel, w=float(w), n_ways=n_ways)

    out = pl.pallas_call(
        kernel,
        out_shape=jax.ShapeDtypeStruct((1, 1), jnp.float32),
        grid_spec=pltpu.PrefetchScalarGridSpec(
            num_scalar_prefetch=0,
            grid=(n_steps,),
            in_specs=[
                # Original features: one full (W, S, D) block, constant block
                # index -> stays resident; only touched on the first step.
                pl.BlockSpec((n_ways, n_shots, feat_dim), lambda g: (0, 0, 0)),
                # Noise features: TR samples streamed per step (double-buffered).
                pl.BlockSpec((tr, n_ways, n_shots, feat_dim), lambda g: (g, 0, 0, 0)),
            ],
            out_specs=pl.BlockSpec((1, 1), lambda g: (0, 0)),
            scratch_shapes=[
                pltpu.VMEM((n_ways, n_shots), jnp.float32),  # hoisted x soft estimate
                pltpu.VMEM((1, 1), jnp.float32),             # running squared-diff sum
            ],
        ),
        compiler_params=pltpu.CompilerParams(
            # Sequential accumulation over the noise stream.
            dimension_semantics=("arbitrary",),
        ),
    )(x, y)

    return out[0, 0]


def _reference(original_output, noise_output, n_shots, n_ways, random_times, w=1.0):
    """Pure-JAX mirror of the PyTorch MetricNoiseLoss forward."""
    d = original_output.shape[-1]
    x = jnp.reshape(original_output, (n_ways, n_shots, d)).astype(jnp.float32)
    y = jnp.reshape(noise_output, (random_times, n_ways, n_shots, d)).astype(jnp.float32)
    proto = x.mean(axis=1)                                          # (W, D)
    nproto = y.mean(axis=2)                                         # (R, W, D)
    xf = x.reshape(n_ways * n_shots, d)
    yf = y.reshape(random_times, n_ways * n_shots, d)
    logits = -jnp.sum((xf[:, None, :] - proto[None, :, :]) ** 2, axis=-1)         # (N, W)
    nlogits = -jnp.sum((yf[:, :, None, :] - nproto[:, None, :, :]) ** 2, axis=-1)  # (R, N, W)
    labels = jnp.arange(n_ways, dtype=jnp.float32)
    soft = jnp.sum(jax.nn.softmax(logits, axis=1) * labels[None, :], axis=1)        # (N,)
    nsoft = jnp.sum(jax.nn.softmax(nlogits, axis=2) * labels[None, None, :], axis=2)  # (R, N)
    return jnp.sum((nsoft - soft[None, :]) ** 2) * w


if __name__ == "__main__":
    key = jax.random.PRNGKey(0)
    n_ways, n_shots, feat_dim = 4, 4, 32
    random_times = 5
    w = 0.5
    n_samples = n_ways * n_shots

    k1, k2 = jax.random.split(key)
    original_output = jax.random.normal(k1, (n_samples, feat_dim), dtype=jnp.float32)
    noise_output = jax.random.normal(
        k2, (random_times, n_samples, feat_dim), dtype=jnp.float32)

    # max_samples_per_step=2 -> 3 grid steps with one padded sample, exercising
    # the multi-step accumulation and the remainder-padding path.
    out = metric_noise_loss(original_output, noise_output, n_shots, n_ways,
                            random_times, w=w, max_samples_per_step=2)
    out = jax.block_until_ready(out)

    ref = _reference(original_output, noise_output, n_shots, n_ways, random_times, w=w)
    assert jnp.allclose(out, ref, atol=1e-3, rtol=1e-3), (out, ref)

    print("KERNEL_OK")
</pallas_src>

<mosaic_0001>
module attributes {stable_mosaic.version = 11 : i64} {
  func.func @_metric_noise_kernel(%arg0: i32, %arg1: memref<4x4x32xf32, #tpu.memory_space<vmem>>, %arg2: memref<2x4x4x32xf32, #tpu.memory_space<vmem>>, %arg3: memref<1x1xf32, #tpu.memory_space<vmem>>, %arg4: memref<4x4xf32, #tpu.memory_space<vmem>>, %arg5: memref<1x1xf32, #tpu.memory_space<vmem>>) attributes {dimension_semantics = [#tpu.dimension_semantics<arbitrary>], iteration_bounds = array<i64: 3>, scalar_prefetch = 0 : i64, scratch_operands = 2 : i64, tpu.core_type = #tpu.core_type<tc>, window_params = [{pipeline_mode = #tpu.pipeline_mode<synchronous>, transform_indices = @transform_0, window_bounds = array<i64: 4, 4, 32>}, {transform_indices = @transform_1, window_bounds = array<i64: 2, 4, 4, 32>}, {pipeline_mode = #tpu.pipeline_mode<synchronous>, transform_indices = @transform_2, window_bounds = array<i64: 1, 1>}]} {
    %c0_i32 = arith.constant 0 : i32
    %0 = arith.cmpi eq, %arg0, %c0_i32 : i32
    %1 = arith.extui %0 : i1 to i32
    %c0_i32_0 = arith.constant 0 : i32
    %2 = arith.cmpi ne, %1, %c0_i32_0 : i32
    scf.if %2 {
      %cst_26 = arith.constant 0.000000e+00 : f32
      %91 = vector.broadcast %cst_26 : f32 to vector<1x1xf32>
      %c0_27 = arith.constant 0 : index
      %c0_28 = arith.constant 0 : index
      %92 = vector.load %arg5[%c0_27, %c0_28] : memref<1x1xf32, #tpu.memory_space<vmem>>, vector<1x1xf32>
      tpu.vector_store %arg5[%c0_27, %c0_28], %91 {strides = array<i32>} : memref<1x1xf32, #tpu.memory_space<vmem>>, vector<1x1xf32>,
      %c0_29 = arith.constant 0 : index
      %c0_30 = arith.constant 0 : index
      %c0_31 = arith.constant 0 : index
      %93 = vector.load %arg1[%c0_29, %c0_30, %c0_31] : memref<4x4x32xf32, #tpu.memory_space<vmem>>, vector<4x4x32xf32>
      %cst_32 = arith.constant dense<0.000000e+00> : vector<4x32xf32>
      %94 = vector.multi_reduction <add>, %93, %cst_32 [1] : vector<4x4x32xf32> to vector<4x32xf32>
      %cst_33 = arith.constant 4.000000e+00 : f32
      %95 = vector.broadcast %cst_33 : f32 to vector<4x32xf32>
      %96 = arith.divf %94, %95 : vector<4x32xf32>
      %97 = vector.extract_strided_slice %96 {offsets = [0, 0], sizes = [1, 32], strides = [1, 1]} : vector<4x32xf32> to vector<1x32xf32>
      %98 = vector.shape_cast %97 : vector<1x32xf32> to vector<1x1x32xf32>
      %99 = vector.broadcast %98 : vector<1x1x32xf32> to vector<4x4x32xf32>
      %100 = arith.subf %93, %99 : vector<4x4x32xf32>
      %101 = arith.mulf %100, %100 : vector<4x4x32xf32>
      %cst_34 = arith.constant dense<0.000000e+00> : vector<4x4xf32>
      %102 = vector.multi_reduction <add>, %101, %cst_34 [2] : vector<4x4x32xf32> to vector<4x4xf32>
      %cst_35 = arith.constant 0.000000e+00 : f32
      %103 = vector.broadcast %cst_35 : f32 to vector<4x4xf32>
      %104 = arith.subf %103, %102 : vector<4x4xf32>
      %cst_36 = arith.constant 1.000000e+00 : f32
      %105 = vector.broadcast %cst_36 : f32 to vector<4x4xf32>
      %cst_37 = arith.constant 0.000000e+00 : f32
      %106 = vector.broadcast %cst_37 : f32 to vector<4x4xf32>
      %107 = vector.extract_strided_slice %96 {offsets = [1, 0], sizes = [1, 32], strides = [1, 1]} : vector<4x32xf32> to vector<1x32xf32>
      %108 = vector.shape_cast %107 : vector<1x32xf32> to vector<1x1x32xf32>
      %109 = vector.broadcast %108 : vector<1x1x32xf32> to vector<4x4x32xf32>
      %110 = arith.subf %93, %109 : vector<4x4x32xf32>
      %111 = arith.mulf %110, %110 : vector<4x4x32xf32>
      %cst_38 = arith.constant dense<0.000000e+00> : vector<4x4xf32>
      %112 = vector.multi_reduction <add>, %111, %cst_38 [2] : vector<4x4x32xf32> to vector<4x4xf32>
      %cst_39 = arith.constant 0.000000e+00 : f32
      %113 = vector.broadcast %cst_39 : f32 to vector<4x4xf32>
      %114 = arith.subf %113, %112 : vector<4x4xf32>
      %115 = arith.maximumf %104, %114 : vector<4x4xf32>
      %116 = arith.subf %104, %115 : vector<4x4xf32>
      %117 = math.exp %116 : vector<4x4xf32>
      %118 = arith.subf %114, %115 : vector<4x4xf32>
      %119 = math.exp %118 : vector<4x4xf32>
      %120 = arith.mulf %117, %105 : vector<4x4xf32>
      %121 = arith.addf %120, %119 : vector<4x4xf32>
      %122 = arith.mulf %117, %106 : vector<4x4xf32>
      %cst_40 = arith.constant 1.000000e+00 : f32
      %123 = vector.broadcast %cst_40 : f32 to vector<4x4xf32>
      %124 = arith.mulf %119, %123 : vector<4x4xf32>
      %125 = arith.addf %122, %124 : vector<4x4xf32>
      %126 = vector.extract_strided_slice %96 {offsets = [2, 0], sizes = [1, 32], strides = [1, 1]} : vector<4x32xf32> to vector<1x32xf32>
      %127 = vector.shape_cast %126 : vector<1x32xf32> to vector<1x1x32xf32>
      %128 = vector.broadcast %127 : vector<1x1x32xf32> to vector<4x4x32xf32>
      %129 = arith.subf %93, %128 : vector<4x4x32xf32>
      %130 = arith.mulf %129, %129 : vector<4x4x32xf32>
      %cst_41 = arith.constant dense<0.000000e+00> : vector<4x4xf32>
      %131 = vector.multi_reduction <add>, %130, %cst_41 [2] : vector<4x4x32xf32> to vector<4x4xf32>
      %cst_42 = arith.constant 0.000000e+00 : f32
      %132 = vector.broadcast %cst_42 : f32 to vector<4x4xf32>
      %133 = arith.subf %132, %131 : vector<4x4xf32>
      %134 = arith.maximumf %115, %133 : vector<4x4xf32>
      %135 = arith.subf %115, %134 : vector<4x4xf32>
      %136 = math.exp %135 : vector<4x4xf32>
      %137 = arith.subf %133, %134 : vector<4x4xf32>
      %138 = math.exp %137 : vector<4x4xf32>
      %139 = arith.mulf %136, %121 : vector<4x4xf32>
      %140 = arith.addf %139, %138 : vector<4x4xf32>
      %141 = arith.mulf %136, %125 : vector<4x4xf32>
      %cst_43 = arith.constant 2.000000e+00 : f32
      %142 = vector.broadcast %cst_43 : f32 to vector<4x4xf32>
      %143 = arith.mulf %138, %142 : vector<4x4xf32>
      %144 = arith.addf %141, %143 : vector<4x4xf32>
      %145 = vector.extract_strided_slice %96 {offsets = [3, 0], sizes = [1, 32], strides = [1, 1]} : vector<4x32xf32> to vector<1x32xf32>
      %146 = vector.shape_cast %145 : vector<1x32xf32> to vector<1x1x32xf32>
      %147 = vector.broadcast %146 : vector<1x1x32xf32> to vector<4x4x32xf32>
      %148 = arith.subf %93, %147 : vector<4x4x32xf32>
      %149 = arith.mulf %148, %148 : vector<4x4x32xf32>
      %cst_44 = arith.constant dense<0.000000e+00> : vector<4x4xf32>
      %150 = vector.multi_reduction <add>, %149, %cst_44 [2] : vector<4x4x32xf32> to vector<4x4xf32>
      %cst_45 = arith.constant 0.000000e+00 : f32
      %151 = vector.broadcast %cst_45 : f32 to vector<4x4xf32>
      %152 = arith.subf %151, %150 : vector<4x4xf32>
      %153 = arith.maximumf %134, %152 : vector<4x4xf32>
      %154 = arith.subf %134, %153 : vector<4x4xf32>
      %155 = math.exp %154 : vector<4x4xf32>
      %156 = arith.subf %152, %153 : vector<4x4xf32>
      %157 = math.exp %156 : vector<4x4xf32>
      %158 = arith.mulf %155, %140 : vector<4x4xf32>
      %159 = arith.addf %158, %157 : vector<4x4xf32>
      %160 = arith.mulf %155, %144 : vector<4x4xf32>
      %cst_46 = arith.constant 3.000000e+00 : f32
      %161 = vector.broadcast %cst_46 : f32 to vector<4x4xf32>
      %162 = arith.mulf %157, %161 : vector<4x4xf32>
      %163 = arith.addf %160, %162 : vector<4x4xf32>
      %164 = arith.divf %163, %159 : vector<4x4xf32>
      %c0_47 = arith.constant 0 : index
      %c0_48 = arith.constant 0 : index
      %165 = vector.load %arg4[%c0_47, %c0_48] : memref<4x4xf32, #tpu.memory_space<vmem>>, vector<4x4xf32>
      tpu.vector_store %arg4[%c0_47, %c0_48], %164 {strides = array<i32>} : memref<4x4xf32, #tpu.memory_space<vmem>>, vector<4x4xf32>,
    } else {
    }
    %c0 = arith.constant 0 : index
    %c0_1 = arith.constant 0 : index
    %c0_2 = arith.constant 0 : index
    %c0_3 = arith.constant 0 : index
    %3 = vector.load %arg2[%c0, %c0_1, %c0_2, %c0_3] : memref<2x4x4x32xf32, #tpu.memory_space<vmem>>, vector<2x4x4x32xf32>
    %cst = arith.constant dense<0.000000e+00> : vector<2x4x32xf32>
    %4 = vector.multi_reduction <add>, %3, %cst [2] : vector<2x4x4x32xf32> to vector<2x4x32xf32>
    %cst_4 = arith.constant 4.000000e+00 : f32
    %5 = vector.broadcast %cst_4 : f32 to vector<2x4x32xf32>
    %6 = arith.divf %4, %5 : vector<2x4x32xf32>
    %7 = vector.extract_strided_slice %6 {offsets = [0, 0, 0], sizes = [2, 1, 32], strides = [1, 1, 1]} : vector<2x4x32xf32> to vector<2x1x32xf32>
    %8 = vector.shape_cast %7 : vector<2x1x32xf32> to vector<2x1x1x32xf32>
    %9 = vector.broadcast %8 : vector<2x1x1x32xf32> to vector<2x4x4x32xf32>
    %10 = arith.subf %3, %9 : vector<2x4x4x32xf32>
    %11 = arith.mulf %10, %10 : vector<2x4x4x32xf32>
    %cst_5 = arith.constant dense<0.000000e+00> : vector<2x4x4xf32>
    %12 = vector.multi_reduction <add>, %11, %cst_5 [3] : vector<2x4x4x32xf32> to vector<2x4x4xf32>
    %cst_6 = arith.constant 0.000000e+00 : f32
    %13 = vector.broadcast %cst_6 : f32 to vector<2x4x4xf32>
    %14 = arith.subf %13, %12 : vector<2x4x4xf32>
    %cst_7 = arith.constant 1.000000e+00 : f32
    %15 = vector.broadcast %cst_7 : f32 to vector<2x4x4xf32>
    %cst_8 = arith.constant 0.000000e+00 : f32
    %16 = vector.broadcast %cst_8 : f32 to vector<2x4x4xf32>
    %17 = vector.extract_strided_slice %6 {offsets = [0, 1, 0], sizes = [2, 1, 32], strides = [1, 1, 1]} : vector<2x4x32xf32> to vector<2x1x32xf32>
    %18 = vector.shape_cast %17 : vector<2x1x32xf32> to vector<2x1x1x32xf32>
    %19 = vector.broadcast %18 : vector<2x1x1x32xf32> to vector<2x4x4x32xf32>
    %20 = arith.subf %3, %19 : vector<2x4x4x32xf32>
    %21 = arith.mulf %20, %20 : vector<2x4x4x32xf32>
    %cst_9 = arith.constant dense<0.000000e+00> : vector<2x4x4xf32>
    %22 = vector.multi_reduction <add>, %21, %cst_9 [3] : vector<2x4x4x32xf32> to vector<2x4x4xf32>
    %cst_10 = arith.constant 0.000000e+00 : f32
    %23 = vector.broadcast %cst_10 : f32 to vector<2x4x4xf32>
    %24 = arith.subf %23, %22 : vector<2x4x4xf32>
    %25 = arith.maximumf %14, %24 : vector<2x4x4xf32>
    %26 = arith.subf %14, %25 : vector<2x4x4xf32>
    %27 = math.exp %26 : vector<2x4x4xf32>
    %28 = arith.subf %24, %25 : vector<2x4x4xf32>
    %29 = math.exp %28 : vector<2x4x4xf32>
    %30 = arith.mulf %27, %15 : vector<2x4x4xf32>
    %31 = arith.addf %30, %29 : vector<2x4x4xf32>
    %32 = arith.mulf %27, %16 : vector<2x4x4xf32>
    %cst_11 = arith.constant 1.000000e+00 : f32
    %33 = vector.broadcast %cst_11 : f32 to vector<2x4x4xf32>
    %34 = arith.mulf %29, %33 : vector<2x4x4xf32>
    %35 = arith.addf %32, %34 : vector<2x4x4xf32>
    %36 = vector.extract_strided_slice %6 {offsets = [0, 2, 0], sizes = [2, 1, 32], strides = [1, 1, 1]} : vector<2x4x32xf32> to vector<2x1x32xf32>
    %37 = vector.shape_cast %36 : vector<2x1x32xf32> to vector<2x1x1x32xf32>
    %38 = vector.broadcast %37 : vector<2x1x1x32xf32> to vector<2x4x4x32xf32>
    %39 = arith.subf %3, %38 : vector<2x4x4x32xf32>
    %40 = arith.mulf %39, %39 : vector<2x4x4x32xf32>
    %cst_12 = arith.constant dense<0.000000e+00> : vector<2x4x4xf32>
    %41 = vector.multi_reduction <add>, %40, %cst_12 [3] : vector<2x4x4x32xf32> to vector<2x4x4xf32>
    %cst_13 = arith.constant 0.000000e+00 : f32
    %42 = vector.broadcast %cst_13 : f32 to vector<2x4x4xf32>
    %43 = arith.subf %42, %41 : vector<2x4x4xf32>
    %44 = arith.maximumf %25, %43 : vector<2x4x4xf32>
    %45 = arith.subf %25, %44 : vector<2x4x4xf32>
    %46 = math.exp %45 : vector<2x4x4xf32>
    %47 = arith.subf %43, %44 : vector<2x4x4xf32>
    %48 = math.exp %47 : vector<2x4x4xf32>
    %49 = arith.mulf %46, %31 : vector<2x4x4xf32>
    %50 = arith.addf %49, %48 : vector<2x4x4xf32>
    %51 = arith.mulf %46, %35 : vector<2x4x4xf32>
    %cst_14 = arith.constant 2.000000e+00 : f32
    %52 = vector.broadcast %cst_14 : f32 to vector<2x4x4xf32>
    %53 = arith.mulf %48, %52 : vector<2x4x4xf32>
    %54 = arith.addf %51, %53 : vector<2x4x4xf32>
    %55 = vector.extract_strided_slice %6 {offsets = [0, 3, 0], sizes = [2, 1, 32], strides = [1, 1, 1]} : vector<2x4x32xf32> to vector<2x1x32xf32>
    %56 = vector.shape_cast %55 : vector<2x1x32xf32> to vector<2x1x1x32xf32>
    %57 = vector.broadcast %56 : vector<2x1x1x32xf32> to vector<2x4x4x32xf32>
    %58 = arith.subf %3, %57 : vector<2x4x4x32xf32>
    %59 = arith.mulf %58, %58 : vector<2x4x4x32xf32>
    %cst_15 = arith.constant dense<0.000000e+00> : vector<2x4x4xf32>
    %60 = vector.multi_reduction <add>, %59, %cst_15 [3] : vector<2x4x4x32xf32> to vector<2x4x4xf32>
    %cst_16 = arith.constant 0.000000e+00 : f32
    %61 = vector.broadcast %cst_16 : f32 to vector<2x4x4xf32>
    %62 = arith.subf %61, %60 : vector<2x4x4xf32>
    %63 = arith.maximumf %44, %62 : vector<2x4x4xf32>
    %64 = arith.subf %44, %63 : vector<2x4x4xf32>
    %65 = math.exp %64 : vector<2x4x4xf32>
    %66 = arith.subf %62, %63 : vector<2x4x4xf32>
    %67 = math.exp %66 : vector<2x4x4xf32>
    %68 = arith.mulf %65, %50 : vector<2x4x4xf32>
    %69 = arith.addf %68, %67 : vector<2x4x4xf32>
    %70 = arith.mulf %65, %54 : vector<2x4x4xf32>
    %cst_17 = arith.constant 3.000000e+00 : f32
    %71 = vector.broadcast %cst_17 : f32 to vector<2x4x4xf32>
    %72 = arith.mulf %67, %71 : vector<2x4x4xf32>
    %73 = arith.addf %70, %72 : vector<2x4x4xf32>
    %74 = arith.divf %73, %69 : vector<2x4x4xf32>
    %c0_18 = arith.constant 0 : index
    %c0_19 = arith.constant 0 : index
    %75 = vector.load %arg4[%c0_18, %c0_19] : memref<4x4xf32, #tpu.memory_space<vmem>>, vector<4x4xf32>
    %76 = vector.shape_cast %75 : vector<4x4xf32> to vector<1x4x4xf32>
    %77 = vector.broadcast %76 : vector<1x4x4xf32> to vector<2x4x4xf32>
    %78 = arith.subf %74, %77 : vector<2x4x4xf32>
    %c0_20 = arith.constant 0 : index
    %c0_21 = arith.constant 0 : index
    %79 = vector.load %arg5[%c0_20, %c0_21] : memref<1x1xf32, #tpu.memory_space<vmem>>, vector<1x1xf32>
    %80 = arith.mulf %78, %78 : vector<2x4x4xf32>
    %81 = vector.shape_cast %80 : vector<2x4x4xf32> to vector<1x2x4x4xf32>
    %cst_22 = arith.constant dense<0.000000e+00> : vector<1xf32>
    %82 = vector.multi_reduction <add>, %81, %cst_22 [1, 2, 3] : vector<1x2x4x4xf32> to vector<1xf32>
    %83 = vector.shape_cast %82 : vector<1xf32> to vector<1x1x1x1xf32>
    %84 = vector.extract %83[0, 0, 0, 0] : f32 from vector<1x1x1x1xf32>
    %85 = vector.broadcast %84 : f32 to vector<1x1xf32>
    %86 = arith.addf %79, %85 : vector<1x1xf32>
    %c0_23 = arith.constant 0 : index
    %c0_24 = arith.constant 0 : index
    %87 = vector.load %arg5[%c0_23, %c0_24] : memref<1x1xf32, #tpu.memory_space<vmem>>, vector<1x1xf32>
    tpu.vector_store %arg5[%c0_23, %c0_24], %86 {strides = array<i32>} : memref<1x1xf32, #tpu.memory_space<vmem>>, vector<1x1xf32>,
    %c2_i32 = arith.constant 2 : i32
    %88 = arith.cmpi eq, %arg0, %c2_i32 : i32
    %89 = arith.extui %88 : i1 to i32
    %c0_i32_25 = arith.constant 0 : i32
    %90 = arith.cmpi ne, %89, %c0_i32_25 : i32
    scf.if %90 {
      %c0_26 = arith.constant 0 : index
      %c0_27 = arith.constant 0 : index
      %91 = vector.load %arg5[%c0_26, %c0_27] : memref<1x1xf32, #tpu.memory_space<vmem>>, vector<1x1xf32>
      %cst_28 = arith.constant 5.000000e-01 : f32
      %92 = vector.broadcast %cst_28 : f32 to vector<1x1xf32>
      %93 = arith.mulf %91, %92 : vector<1x1xf32>
      %c0_29 = arith.constant 0 : index
      %c0_30 = arith.constant 0 : index
      %94 = vector.load %arg3[%c0_29, %c0_30] : memref<1x1xf32, #tpu.memory_space<vmem>>, vector<1x1xf32>
      tpu.vector_store %arg3[%c0_29, %c0_30], %93 {strides = array<i32>} : memref<1x1xf32, #tpu.memory_space<vmem>>, vector<1x1xf32>,
    } else {
    }
    return
  }
  func.func @transform_0(%arg0: i32) -> (i32, i32, i32) {
    %c0_i32 = arith.constant 0 : i32
    %c0_i32_0 = arith.constant 0 : i32
    %c0_i32_1 = arith.constant 0 : i32
    %c0_i32_2 = arith.constant 0 : i32
    return %c0_i32, %c0_i32_0, %c0_i32_1 : i32, i32, i32
  }
  func.func @transform_1(%arg0: i32) -> (i32, i32, i32, i32) {
    %c0_i32 = arith.constant 0 : i32
    %c0_i32_0 = arith.constant 0 : i32
    %c0_i32_1 = arith.constant 0 : i32
    %c0_i32_2 = arith.constant 0 : i32
    return %arg0, %c0_i32, %c0_i32_0, %c0_i32_1 : i32, i32, i32, i32
  }
  func.func @transform_2(%arg0: i32) -> (i32, i32) {
    %c0_i32 = arith.constant 0 : i32
    %c0_i32_0 = arith.constant 0 : i32
    %c0_i32_1 = arith.constant 0 : i32
    return %c0_i32, %c0_i32_0 : i32, i32
  }
}

</mosaic_0001>

<bundles_post_ra>
// kernel: tpu_custom_call.1
= control target key start
LH: loop header
LB: loop body
LE: loop exit
PB: predicated region body
PF: predicated region fallthrough
CT: control target
= control target key end

     0   :  { %7 = vsyncpa [#allocation5], 0  ;;  %s2287_s0 = inlined_call_operand.hbm [shape: f32[4,4,32], index: 0, kind: input, shape index: {}]   ;;  %s2288_s1 = inlined_call_operand.hbm [shape: f32[6,4,4,32], index: 1, kind: input, shape index: {}]   ;;  %s2289_s2 = inlined_call_operand.hbm [shape: f32[1,1], index: 2, kind: output, shape index: {}]  }
   0x1   :  { %8 = vsyncpa [#allocation8], 0 }
   0x2   :  { %10 = vsyncpa [#allocation8 + $0x1], 0 }
   0x3   :  { %11 = vsyncpa [#allocation6], 0  ;;  %s1659_s9 = smov 0   ;;  %s1661_s10 = smov 0  }
   0x4   :  { %s1663_s11 = smov 0   ;;  %s1665_s12 = smov 0  }
   0x5 LB: > { %s1678_s13 = sadd.s32 4294967295, %s1635_s12   ;;  %p58_p0 = scmp.ne.s32.totalorder %s1627_s10, %s1623_s9  ;;  %s1635_s12 = sphi %s1665_s12, %s2305_s12   ;;  %s1631_s11 = sphi %s1663_s11, %s2304_s11   ;;  %s1627_s10 = sphi %s1661_s10, %s2303_s10   ;;  %s1623_s9 = sphi %s1659_s9, %s2302_s9  }
   0x6   : > { %p2290_p1 = scmp.eq.s32.totalorder %s1678_s13, 0  ;;  %p1258_p2 = scmp.ge.s32.totalorder %s1635_s12, 1 }
   0x7   : > { %p90_p3 = scmp.lt.s32.totalorder %s1635_s12, 4  ;;  %s1637_s16 = smov [#allocation4]  }
   0x8   : > { %p1687_p5 = por %p2290_p1, %p58_p0  ;;  %s102_s17 = sshll.u32 %s1637_s16, 4  ;;  %s103_s17 = int_to_ptr.vmem [resolvable:$true] %s102_s17 }
   0x9   : > { %p1691_p6 = pnand %p1258_p2, %p90_p3  ;;  %s1704_s19 = sadd.s32 1, %s1635_s12  }
   0xa   : > { %s2293_s14 = scalar_select %p1687_p5, 1, 0 }
   0xb   : > { %s2294_s15 = scalar_select %p1691_p6, 1, 0 }
   0xc   : > { %p1288_p7 = pneg %p1691_p6  ;;  %s45_s20 = sadd.s32 1, %s1631_s11 }
   0xd   : > { %s42_s21 = ssub.s32 %s1635_s12, %s1704_s19  ;;  %s1509_s24 = scalar_lea.hbm %s2287_s0, 256 }
   0xe   : > { %p1699_p8 = pnand %p1288_p7, %p2290_p1  ;;  %p1510_p9 = scmp.ne.s32.totalorder %s2287_s0, %s1509_s24 }
   0xf   : > { %p1516_p13 = scmp.lt.u32.totalorder %s1509_s24, %s2287_s0 }
  0x10   : > { %p1511_p10 = pneg %p1699_p8 }
  0x12   : > { %p1512_p11 = pnand %p1511_p10, %p1510_p9 }
  0x14   : > { %p1513_p12 = pneg %p1512_p11 }
  0x16   : > { %p1518_p0 = pnand %p1516_p13, %p1513_p12 }
  0x18   : > { %1521 = shalt.err (!%p1518_p0)
}
  0x19   : > { %s1522_s29 = scalar_lea.vmem %s103_s17, 256  ;;  %p1530_p4 = scmp.lt.s32.totalorder %s103_s17, %s103_s17 }
  0x1a   : > { %p1523_p2 = scmp.ne.s32.totalorder %s103_s17, %s1522_s29  ;;  %p1531_p1 = scmp.lt.s32.totalorder %s1522_s29, %s1522_s29 }
  0x1c   : > { %p1525_p3 = pnand %p1523_p2, %p1511_p10  ;;  %p1532_p5 = por %p1531_p1, %p1530_p4 }
  0x1e   : > { %p1526_p7 = pneg %p1525_p3 }
  0x20   : > { %p1533_p6 = pnand %p1532_p5, %p1526_p7 }
  0x22   : > { %1536 = shalt.err (!%p1533_p6)
}
  0x23   : > { %s1638_s30 = smov 64   ;;  %s1639_s3 = smov 4  }
  0x24   : > { %1291 = dma.hbm_to_vmem [thread:$0]  (!%p1699_p8), %s2287_s0, 256, %s103_s17, [#allocation5], %s1638_s30, %s1638_s30, %s1639_s3  }
  0x25   : > { %p43_p1 = scmp.eq.s32.totalorder %s42_s21, 0  ;;  %p52_p4 = scmp.ne.s32.totalorder %s1631_s11, %s1627_s10 }
  0x26   : > { %p53_p5 = scmp.eq.s32.totalorder %s1635_s12, 0  ;;  %p1297_p6 = scmp.lt.s32.totalorder %s1635_s12, 3 }
  0x27   : > { %s1733_s6 = scalar_select %p43_p1, %s1631_s11, %s45_s20  }
  0x28   : > { %p54_p9 = por %p53_p5, %p52_p4  ;;  %s116_s7 = sand.u32 1, %s1631_s11  }
  0x29   : > { %s1261_s8 = sshll.u32 %s116_s7, 5  ;;  %s1275_s9 = sshll.u32 %s1635_s12, 9 }
  0x2a   : > { %s1740_s18 = scalar_lea.hbm %s2288_s1, %s1275_s9  ;;  %s120_s17 = scalar_lea.vmem [#allocation7], %s1261_s8 }
  0x2b   : > { %s128_s21 = sshll.u32 %s120_s17, 4  ;;  %p1744_p8 = pnand %p1297_p6, %p54_p9  ;;  %s1742_s21 = int_to_ptr.vmem [resolvable:$true] %s128_s21 }
  0x2c   : > { %s1748_s12 = scalar_lea.sflag [#allocation8], %s116_s7  ;;  %s1537_s23 = scalar_lea.hbm %s1740_s18, 512 }
  0x2d   : > { %p1538_p10 = scmp.ne.s32.totalorder %s1740_s18, %s1537_s23  ;;  %p1539_p11 = pneg %p1744_p8 }
  0x2e   : > { %s1542_s26 = scalar_lea.hbm %s2288_s1, 1536  ;;  %p1543_p0 = scmp.lt.u32.totalorder %s1740_s18, %s2288_s1 }
  0x2f   : > { %p1540_p12 = pnand %p1539_p11, %p1538_p10  ;;  %p1544_p2 = scmp.lt.u32.totalorder %s1542_s26, %s1537_s23 }
  0x30   : > { %p1546_p7 = scmp.lt.u32.totalorder %s1537_s23, %s1740_s18 }
  0x31   : > { %p1541_p13 = pneg %p1540_p12  ;;  %p1545_p3 = por %p1544_p2, %p1543_p0 }
  0x33   : > { %p1547_p1 = por %p1546_p7, %p1545_p3 }
  0x35   : > { %p1548_p4 = pnand %p1547_p1, %p1541_p13 }
  0x37   : > { %1551 = shalt.err (!%p1548_p4)
}
  0x38   : > { %s1552_s29 = scalar_lea.vmem %s1742_s21, 512  ;;  %s1640_s4 = smov [#allocation7]  }
  0x39   : > { %p1553_p5 = scmp.ne.s32.totalorder %s1742_s21, %s1552_s29  ;;  %s1557_s5 = sshll.u32 %s1640_s4, 4  ;;  %s1558_s5 = int_to_ptr.vmem [resolvable:$false] %s1557_s5 }
  0x3a   : > { %s1559_s7 = scalar_lea.vmem %s1558_s5, 1024  ;;  %p1560_p10 = scmp.lt.s32.totalorder %s1742_s21, %s1558_s5 }
  0x3b   : > { %p1555_p6 = pnand %p1553_p5, %p1539_p11  ;;  %p1561_p12 = scmp.lt.s32.totalorder %s1559_s7, %s1552_s29 }
  0x3d   : > { %p1556_p9 = pneg %p1555_p6  ;;  %p1562_p0 = por %p1561_p12, %p1560_p10 }
  0x3f   : > { %p1563_p2 = pnand %p1562_p0, %p1556_p9 }
  0x41   : > { %1566 = shalt.err (!%p1563_p2)
}
  0x42   : > { %1295 = dma.hbm_to_vmem [thread:$0]  (!%p1744_p8), %s1740_s18, 512, %s1742_s21, %s1748_s12, %s1638_s30, %s1638_s30, %s1639_s3  }
  0x43   : > { %p2297_p11 = scmp.ne.s32.totalorder %s2294_s15, 0 }
  0x44   : > { %p2298_p13 = scmp.eq.s32.totalorder (!%p2297_p11), %s1678_s13, 0 }
  0x45   : > { %140 = sbr.rel (%p2297_p11) target bundleno = 968 (0x3c8), region = 28 }
  0x4c   : > { %1610 = dma.done.wait (%p2298_p13), [#allocation5], 256   ;;  %p2299_p3 = pmov %p2298_p13 }
  0x4d   : > { %s146_s8 = sand.u32 1, %s1627_s10   ;;  %p2300_p7 = scmp.ne.s32.totalorder %s2293_s14, 0 }
  0x4e   : > { %1612 = vsyncadd (%p2299_p3), [#allocation5], 4294967040  ;;  %s1267_s9 = sshll.u32 %s146_s8, 5  ;;  %s147_s16 = scalar_lea.sflag [#allocation8], %s146_s8 }
  0x4f   : > { %s1786_s22 = scalar_lea.vmem [#allocation7], %s1267_s9 }
  0x50   : > { %1614 = dma.done.wait (%p2300_p7), %s147_s16, 512  }
  0x51   : > { %1616 = vsyncadd (%p2300_p7), %s147_s16, 4294966784  ;;  %p2301_p8 = scmp.ne.s32.totalorder %s1678_s13, 0 }
  0x52   : > { %v1794_v0 = vld [vmem:[#allocation4] sm:$0xf] (!%p2301_p8)  ;;  %v1796_v1 = vld [vmem:[#allocation4 + $0x4] sm:$0xf] (!%p2301_p8)  ;;  %vm177_vm0 = vcmask (!%p2301_p8), 257024   ;;  %vm171_vm1 = vcmask (!%p2301_p8), 0  }
  0x53   : > { %170 = sbr.rel (%p2301_p8) target bundleno = 318 (0x13e), region = 40  ;;  %v185_v2 = vsel (!%p2301_p8), %vm177_vm0, %v1796_v1, 0.0  ;;  %v178_v3 = vsel (!%p2301_p8), %vm177_vm0, %v1794_v0, 0.0  ;;  %v1802_v4 = vld [vmem:[#allocation4 + $0x8] sm:$0xf] (!%p2301_p8)  ;;  %vm473_vm2 = vcmask (!%p2301_p8), 1041409  }
  0x54   : > { %v1804_v5 = vld [vmem:[#allocation4 + $0xc] sm:$0xf] (!%p2301_p8)  ;;  %v186_v6 = vrot.slane (!%p2301_p8), %v185_v2, 4  ;;  %v179_v7 = vrot.slane (!%p2301_p8), %v178_v3, 4  ;;  %v192_v8 = vsel (!%p2301_p8), %vm177_vm0, %v1802_v4, 0.0  ;;  %vm475_vm3 = vcmask (!%p2301_p8), 1042434  }
  0x55   : > { %v199_v9 = vsel (!%p2301_p8), %vm177_vm0, %v1804_v5, 0.0  ;;  %v193_v10 = vrot.slane (!%p2301_p8), %v192_v8, 4  ;;  %vm477_vm4 = vcmask (!%p2301_p8), 1043459   ;;  %vm480_vm5 = vcmask (!%p2301_p8), 27648  }
  0x56   : > { %v187_v11 = vadd.f32 (!%p2301_p8), %v186_v6, %v185_v2  ;;  %v180_v12 = vadd.f32 (!%p2301_p8), %v179_v7, %v178_v3  ;;  %v200_v13 = vrot.slane (!%p2301_p8), %v199_v9, 4 }
  0x57   : > { %v194_v14 = vadd.f32 (!%p2301_p8), %v193_v10, %v192_v8 }
  0x58   : > { %v188_v15 = vrot.slane (!%p2301_p8), %v187_v11, 2  ;;  %v181_v16 = vrot.slane (!%p2301_p8), %v180_v12, 2  ;;  %v201_v21 = vadd.f32 (!%p2301_p8), %v200_v13, %v199_v9 }
  0x59   : > { %v195_v17 = vrot.slane (!%p2301_p8), %v194_v14, 2 }
  0x5a   : > { %v189_v18 = vadd.f32 %v188_v15, %v187_v11  ;;  %v182_v19 = vadd.f32 %v181_v16, %v180_v12  ;;  %v202_v27 = vrot.slane %v201_v21, 2 }
  0x5b   : > { %v196_v20 = vadd.f32 %v195_v17, %v194_v14 }
  0x5c   : > { %v190_v22 = vrot.slane %v189_v18, 1  ;;  %v183_v23 = vrot.slane %v182_v19, 1  ;;  %v203_v37 = vadd.f32 %v202_v27, %v201_v21 }
  0x5d   : > { %v197_v26 = vrot.slane %v196_v20, 1 }
  0x5e   : > { %v191_v24 = vadd.f32 %v190_v22, %v189_v18  ;;  %v184_v25 = vadd.f32 %v183_v23, %v182_v19  ;;  %v204_v47 = vrot.slane %v203_v37, 1 }
  0x5f   : > { %v198_v36 = vadd.f32 %v197_v26, %v196_v20  ;;  %v1641_v20 = vmov 0.0  }
  0x60   : > { %v208_v28 = vmul.f32 0.25, %v191_v24  ;;  %v207_v29 = vmul.f32 0.25, %v184_v25  ;;  %v205_v54 = vadd.f32 %v204_v47, %v203_v37  ;;  %172 = vst.msk [vmem:[#allocation3] sm:$0x1] %vm171_vm1, %v1641_v20 }
  0x61   : > { %v209_v46 = vmul.f32 0.25, %v198_v36 }
  0x62   : > { %v235_v30 = vsub.f32 %v1794_v0, %v208_v28  ;;  %v211_v31 = vsub.f32 %v1794_v0, %v207_v29  ;;  %v236_v32 = vsub.f32 %v1796_v1, %v208_v28  ;;  %v212_v33 = vsub.f32 %v1796_v1, %v207_v29 }
  0x63   : > { %v237_v34 = vsub.f32 %v1802_v4, %v208_v28  ;;  %v213_v35 = vsub.f32 %v1802_v4, %v207_v29  ;;  %v238_v44 = vsub.f32 %v1804_v5, %v208_v28  ;;  %v214_v45 = vsub.f32 %v1804_v5, %v207_v29 }
  0x64   : > { %v239_v38 = vmul.f32 %v235_v30, %v235_v30  ;;  %v215_v39 = vmul.f32 %v211_v31, %v211_v31  ;;  %v240_v40 = vmul.f32 %v236_v32, %v236_v32  ;;  %v216_v41 = vmul.f32 %v212_v33, %v212_v33 }
  0x65   : > { %v241_v50 = vmul.f32 %v237_v34, %v237_v34  ;;  %v217_v51 = vmul.f32 %v213_v35, %v213_v35  ;;  %v242_v52 = vmul.f32 %v238_v44, %v238_v44  ;;  %v218_v53 = vmul.f32 %v214_v45, %v214_v45 }
  0x66   : > { %v243_v42 = vsel %vm177_vm0, %v239_v38, 0.0  ;;  %v219_v43 = vsel %vm177_vm0, %v215_v39, 0.0  ;;  %v246_v48 = vsel %vm177_vm0, %v240_v40, 0.0  ;;  %v222_v49 = vsel %vm177_vm0, %v216_v41, 0.0 }
  0x67   : > { %244 = vadd.xlane.f32.xlu1 %v243_v42  ;;  %220 = vadd.xlane.f32.xlu0 %v219_v43  ;;  %v249_v55 = vsel %vm177_vm0, %v241_v50, 0.0  ;;  %v225_v56 = vsel %vm177_vm0, %v217_v51, 0.0  ;;  %v300_v57 = vsub.f32 %v1796_v1, %v209_v46  ;;  %v299_v58 = vsub.f32 %v1794_v0, %v209_v46 }
  0x68   : > { %v252_v59 = vsel %vm177_vm0, %v242_v52, 0.0  ;;  %v228_v60 = vsel %vm177_vm0, %v218_v53, 0.0  ;;  %v210_v61 = vmul.f32 0.25, %v205_v54  ;;  %v302_v2 = vsub.f32 %v1804_v5, %v209_v46 }
  0x69   : > { %v304_v62 = vmul.f32 %v300_v57, %v300_v57  ;;  %v303_v63 = vmul.f32 %v299_v58, %v299_v58  ;;  %v301_v3 = vsub.f32 %v1802_v4, %v209_v46 }
  0x6a   : > { %v372_v6 = vsub.f32 %v1796_v1, %v210_v61  ;;  %v371_v7 = vsub.f32 %v1794_v0, %v210_v61  ;;  %v306_v10 = vmul.f32 %v302_v2, %v302_v2  ;;  %v374_v12 = vsub.f32 %v1804_v5, %v210_v61 }
  0x6b   : > { %247 = vadd.xlane.f32.xlu1 %v246_v48  ;;  %223 = vadd.xlane.f32.xlu0 %v222_v49  ;;  %v310_v8 = vsel %vm177_vm0, %v304_v62, 0.0  ;;  %v307_v9 = vsel %vm177_vm0, %v303_v63, 0.0  ;;  %v305_v11 = vmul.f32 %v301_v3, %v301_v3  ;;  %v373_v13 = vsub.f32 %v1802_v4, %v210_v61 }
  0x6c   : > { %v316_v14 = vsel %vm177_vm0, %v306_v10, 0.0  ;;  %v376_v16 = vmul.f32 %v372_v6, %v372_v6  ;;  %v375_v1 = vmul.f32 %v371_v7, %v371_v7  ;;  %v378_v18 = vmul.f32 %v374_v12, %v374_v12 }
  0x6d   : > { %v313_v15 = vsel %vm177_vm0, %v305_v11, 0.0  ;;  %v377_v19 = vmul.f32 %v373_v13, %v373_v13 }
  0x6e   : > { %v382_v0 = vsel %vm177_vm0, %v376_v16, 0.0  ;;  %v379_v17 = vsel %vm177_vm0, %v375_v1, 0.0  ;;  %v388_v5 = vsel %vm177_vm0, %v378_v18, 0.0 }
  0x6f   : > { %250 = vadd.xlane.f32.xlu1 %v249_v55  ;;  %226 = vadd.xlane.f32.xlu0 %v225_v56  ;;  %v385_v4 = vsel %vm177_vm0, %v377_v19, 0.0 }
  0x73   : > { %253 = vadd.xlane.f32.xlu1 %v252_v59  ;;  %229 = vadd.xlane.f32.xlu0 %v228_v60 }
  0x77   : > { %311 = vadd.xlane.f32.xlu1 %v310_v8  ;;  %308 = vadd.xlane.f32.xlu0 %v307_v9 }
  0x7b   : > { %317 = vadd.xlane.f32.xlu1 %v316_v14  ;;  %314 = vadd.xlane.f32.xlu0 %v313_v15 }
  0x7f   : > { %383 = vadd.xlane.f32.xlu1 %v382_v0  ;;  %380 = vadd.xlane.f32.xlu0 %v379_v17 }
  0x83   : > { %389 = vadd.xlane.f32.xlu1 %v388_v5  ;;  %386 = vadd.xlane.f32.xlu0 %v385_v4 }
  0xf4   : > { %v245_v21 = vpop.xlane.xlu1 %244  ;;  %v221_v22 = vpop.xlane.xlu0 %220 }
  0xf5   : > { %v255_v23 = vsub.f32 0.0, %v245_v21  ;;  %v231_v24 = vsub.f32 0.0, %v221_v22 }
  0xf7   : > { %v259_v29 = vmax.f32 %v231_v24, %v255_v23 }
  0xf8   : > { %v248_v25 = vpop.xlane.xlu1 %247  ;;  %v224_v26 = vpop.xlane.xlu0 %223 }
  0xf9   : > { %v256_v27 = vsub.f32 0.0, %v248_v25  ;;  %v232_v28 = vsub.f32 0.0, %v224_v26  ;;  %v263_v35 = vsub.f32 %v231_v24, %v259_v29  ;;  %v275_v36 = vsub.f32 %v255_v23, %v259_v29 }
  0xfb   : > { %v260_v32 = vmax.f32 %v232_v28, %v256_v27  ;;  %v267_v44 = vmul.f32 1.442695, %v263_v35  ;;  %v279_v46 = vmul.f32 1.442695, %v275_v36 }
  0xfc   : > { %v251_v30 = vpop.xlane.xlu1 %250  ;;  %v227_v31 = vpop.xlane.xlu0 %226 }
  0xfd   : > { %v257_v33 = vsub.f32 0.0, %v251_v30  ;;  %v233_v34 = vsub.f32 0.0, %v227_v31  ;;  %v264_v40 = vsub.f32 %v232_v28, %v260_v32  ;;  %v276_v43 = vsub.f32 %v256_v27, %v260_v32 }
  0xfe   : > { %1339 = vpow2.f32 %v267_v44 }
  0xff   : > { %v1842_v37 = vmax.f32 %v233_v34, %v257_v33  ;;  %v269_v50 = vmul.f32 1.442695, %v264_v40  ;;  %v281_v54 = vmul.f32 1.442695, %v276_v43  ;;  %1341 = vpow2.f32 %v279_v46 }
 0x100   : > { %v254_v38 = vpop.xlane.xlu1 %253  ;;  %v230_v39 = vpop.xlane.xlu0 %229 }
 0x101   : > { %v258_v41 = vsub.f32 0.0, %v254_v38  ;;  %v234_v42 = vsub.f32 0.0, %v230_v39  ;;  %v265_v47 = vsub.f32 %v233_v34, %v1842_v37  ;;  %v277_v51 = vsub.f32 %v257_v33, %v1842_v37 }
 0x102   : > { %1343 = vpow2.f32 %v269_v50 }
 0x103   : > { %v262_v45 = vmax.f32 %v234_v42, %v258_v41  ;;  %v271_v57 = vmul.f32 1.442695, %v265_v47  ;;  %v283_v62 = vmul.f32 1.442695, %v277_v51  ;;  %1345 = vpow2.f32 %v281_v54 }
 0x104   : > { %v312_v48 = vpop.xlane.xlu1 %311  ;;  %v309_v49 = vpop.xlane.xlu0 %308 }
 0x105   : > { %v320_v52 = vsub.f32 0.0, %v312_v48  ;;  %v319_v53 = vsub.f32 0.0, %v309_v49  ;;  %v266_v55 = vsub.f32 %v234_v42, %v262_v45  ;;  %v278_v58 = vsub.f32 %v258_v41, %v262_v45 }
 0x106   : > { %1347 = vpow2.f32 %v271_v57 }
 0x107   : > { %v324_v56 = vmax.f32 %v260_v32, %v320_v52  ;;  %v323_v59 = vmax.f32 %v259_v29, %v319_v53  ;;  %v273_v2 = vmul.f32 1.442695, %v266_v55  ;;  %v285_v10 = vmul.f32 1.442695, %v278_v58 }
 0x108   : > { %v318_v60 = vpop.xlane.xlu1 %317  ;;  %v315_v61 = vpop.xlane.xlu0 %314  ;;  %1349 = vpow2.f32 %v283_v62 }
 0x109   : > { %v328_v63 = vsub.f32 %v260_v32, %v324_v56  ;;  %v327_v3 = vsub.f32 %v259_v29, %v323_v59  ;;  %v340_v7 = vsub.f32 %v320_v52, %v324_v56  ;;  %v322_v8 = vsub.f32 0.0, %v318_v60  ;;  %v1851_v22 = vpop.eup %1339 }
 0x10a   : > { %v321_v9 = vsub.f32 0.0, %v315_v61  ;;  %v339_v11 = vsub.f32 %v319_v53, %v323_v59  ;;  %1351 = vpow2.f32 %v273_v2  ;;  %v1853_v24 = vpop.eup %1341 }
 0x10b   : > { %v333_v6 = vmul.f32 1.442695, %v328_v63  ;;  %v331_v14 = vmul.f32 1.442695, %v327_v3  ;;  %v326_v15 = vmax.f32 %v262_v45, %v322_v8  ;;  %v345_v17 = vmul.f32 1.442695, %v340_v7 }
 0x10c   : > { %v384_v12 = vpop.xlane.xlu1 %383  ;;  %v381_v13 = vpop.xlane.xlu0 %380  ;;  %v1847_v16 = vmax.f32 %v1842_v37, %v321_v9  ;;  %v343_v5 = vmul.f32 1.442695, %v339_v11 }
 0x10d   : > { %v392_v1 = vsub.f32 0.0, %v384_v12  ;;  %v391_v0 = vsub.f32 0.0, %v381_v13  ;;  %1353 = vpow2.f32 %v333_v6  ;;  %v330_v18 = vsub.f32 %v262_v45, %v326_v15  ;;  %v1344_v29 = vpop.eup %1343 }
 0x10e   : > { %v329_v19 = vsub.f32 %v1842_v37, %v1847_v16  ;;  %1355 = vpow2.f32 %v285_v10  ;;  %v342_v25 = vsub.f32 %v322_v8, %v326_v15  ;;  %v1855_v32 = vpop.eup %1345  ;;  %v341_v40 = vsub.f32 %v321_v9, %v1847_v16 }
 0x10f   : > { %v396_v4 = vmax.f32 %v324_v56, %v392_v1  ;;  %v395_v20 = vmax.f32 %v323_v59, %v391_v0  ;;  %1357 = vpow2.f32 %v331_v14  ;;  %v337_v23 = vmul.f32 1.442695, %v330_v18 }
 0x110   : > { %v390_v21 = vpop.xlane.xlu1 %389  ;;  %v335_v26 = vmul.f32 1.442695, %v329_v19  ;;  %1359 = vpow2.f32 %v345_v17  ;;  %v387_v35 = vpop.xlane.xlu0 %386  ;;  %v349_v39 = vmul.f32 1.442695, %v342_v25  ;;  %v288_v51 = vadd.f32 %v1855_v32, %v1344_v29 }
 0x111   : > { %v400_v27 = vsub.f32 %v324_v56, %v396_v4  ;;  %v394_v28 = vsub.f32 0.0, %v390_v21  ;;  %v412_v30 = vsub.f32 %v392_v1, %v396_v4  ;;  %v399_v31 = vsub.f32 %v323_v59, %v395_v20  ;;  %v1348_v38 = vpop.eup %1347 }
 0x112   : > { %1361 = vpow2.f32 %v343_v5  ;;  %v411_v34 = vsub.f32 %v391_v0, %v395_v20  ;;  %v1858_v42 = vpop.eup %1349  ;;  %v393_v44 = vsub.f32 0.0, %v387_v35  ;;  %v347_v52 = vmul.f32 1.442695, %v341_v40 }
 0x113   : > { %v405_v33 = vmul.f32 1.442695, %v400_v27  ;;  %1363 = vpow2.f32 %v337_v23  ;;  %v417_v36 = vmul.f32 1.442695, %v412_v30  ;;  %v403_v37 = vmul.f32 1.442695, %v399_v31 }
 0x114   : > { %1365 = vpow2.f32 %v335_v26  ;;  %v398_v41 = vmax.f32 %v326_v15, %v394_v28  ;;  %v415_v43 = vmul.f32 1.442695, %v411_v34  ;;  %v1352_v45 = vpop.eup %1351  ;;  %v397_v49 = vmax.f32 %v1847_v16, %v393_v44 }
 0x115   : > { %1367 = vpow2.f32 %v405_v33  ;;  %v287_v56 = vadd.f32 %v1853_v24, %v1851_v22  ;;  %v292_v10 = vmul.f32 0.0, %v1344_v29  ;;  %v289_v1 = vadd.f32 %v1858_v42, %v1348_v38 }
 0x116   : > { %1369 = vpow2.f32 %v417_v36  ;;  %v402_v46 = vsub.f32 %v326_v15, %v398_v41  ;;  %v414_v48 = vsub.f32 %v394_v28, %v398_v41  ;;  %v401_v58 = vsub.f32 %v1847_v16, %v397_v49 }
 0x117   : > { %v1354_v47 = vpop.eup %1353  ;;  %1371 = vpow2.f32 %v403_v37  ;;  %v413_v59 = vsub.f32 %v393_v44, %v397_v49  ;;  %v291_v16 = vmul.f32 0.0, %v1851_v22  ;;  %v294_v0 = vmul.f32 0.0, %v1352_v45 }
 0x118   : > { %v1356_v50 = vpop.eup %1355  ;;  %1373 = vpow2.f32 %v349_v39  ;;  %v409_v54 = vmul.f32 1.442695, %v402_v46  ;;  %v421_v55 = vmul.f32 1.442695, %v414_v48  ;;  %v352_v57 = vmul.f32 %v1354_v47, %v288_v51 }
 0x119   : > { %v1358_v53 = vpop.eup %1357  ;;  %1375 = vpow2.f32 %v415_v43  ;;  %v407_v63 = vmul.f32 1.442695, %v401_v58  ;;  %v419_v3 = vmul.f32 1.442695, %v413_v59  ;;  %v290_v7 = vadd.f32 %v1356_v50, %v1352_v45 }
 0x11a   : > { %v1360_v60 = vpop.eup %1359  ;;  %1377 = vpow2.f32 %v409_v54  ;;  %v351_v62 = vmul.f32 %v1358_v53, %v287_v56  ;;  %v296_v20 = vadd.f32 %v1855_v32, %v292_v10  ;;  %v295_v26 = vadd.f32 %v1853_v24, %v291_v16 }
 0x11b   : > { %1379 = vpow2.f32 %v347_v52  ;;  %v356_v8 = vadd.f32 %v1360_v60, %v352_v57  ;;  %v293_v27 = vmul.f32 0.0, %v1348_v38  ;;  %v298_v28 = vadd.f32 %v1356_v50, %v294_v0 }
 0x11c   : > { %v1362_v61 = vpop.eup %1361  ;;  %1381 = vpow2.f32 %v421_v55  ;;  %v360_v22 = vmul.f32 %v1354_v47, %v296_v20  ;;  %v364_v30 = vmul.f32 2.0, %v1360_v60  ;;  %v359_v34 = vmul.f32 %v1358_v53, %v295_v26 }
 0x11d   : > { %v1364_v2 = vpop.eup %1363  ;;  %1383 = vpow2.f32 %v407_v63  ;;  %v355_v12 = vadd.f32 %v1362_v61, %v351_v62  ;;  %v363_v35 = vmul.f32 2.0, %v1362_v61  ;;  %v297_v24 = vadd.f32 %v1858_v42, %v293_v27 }
 0x11e   : > { %v1366_v6 = vpop.eup %1365  ;;  %v354_v13 = vmul.f32 %v1364_v2, %v290_v7  ;;  %1385 = vpow2.f32 %v419_v3  ;;  %v362_v39 = vmul.f32 %v1364_v2, %v298_v28  ;;  %v368_v38 = vadd.f32 %v364_v30, %v360_v22 }
 0x11f   : > { %v1368_v9 = vpop.eup %1367  ;;  %v353_v4 = vmul.f32 %v1366_v6, %v289_v1  ;;  %v367_v44 = vadd.f32 %v363_v35, %v359_v34  ;;  %v455_v45 = vlaneseq  ;;  %v361_v48 = vmul.f32 %v1366_v6, %v297_v24 }
 0x120   : > { %v1370_v11 = vpop.eup %1369  ;;  %v424_v14 = vmul.f32 %v1368_v9, %v356_v8  ;;  %v432_v50 = vmul.f32 %v1368_v9, %v368_v38 }
 0x121   : > { %v1372_v15 = vpop.eup %1371  ;;  %v436_v51 = vmul.f32 3.0, %v1370_v11  ;;  %v456_v55 = vand.u32 127, %v455_v45  ;;  %v458_v56 = vshrl.u32 %v455_v45, 7 }
 0x122   : > { %v1374_v17 = vpop.eup %1373  ;;  %v428_v18 = vadd.f32 %v1370_v11, %v424_v14  ;;  %v423_v19 = vmul.f32 %v1372_v15, %v355_v12  ;;  %v431_v52 = vmul.f32 %v1372_v15, %v367_v44 }
 0x123   : > { %v1376_v5 = vpop.eup %1375  ;;  %v358_v21 = vadd.f32 %v1374_v17, %v354_v13  ;;  %v366_v32 = vmul.f32 2.0, %v1374_v17  ;;  %v440_v60 = vadd.f32 %v436_v51, %v432_v50  ;;  %v459_v2 = vsub.s32 %v456_v55, %v458_v56 }
 0x124   : > { %v427_v23 = vadd.f32 %v1376_v5, %v423_v19  ;;  %v1378_v25 = vpop.eup %1377  ;;  %1387 = vrcp.f32 %v428_v18  ;;  %v435_v53 = vmul.f32 3.0, %v1376_v5 }
 0x125   : > { %v1380_v29 = vpop.eup %1379  ;;  %v426_v31 = vmul.f32 %v1378_v25, %v358_v21  ;;  %v370_v47 = vadd.f32 %v366_v32, %v362_v39 }
 0x126   : > { %1389 = vrcp.f32 %v427_v23  ;;  %v1382_v33 = vpop.eup %1381  ;;  %v357_v36 = vadd.f32 %v1380_v29, %v353_v4  ;;  %v365_v49 = vmul.f32 2.0, %v1380_v29  ;;  %v439_v61 = vadd.f32 %v435_v53, %v431_v52 }
 0x127   : > { %v1384_v37 = vpop.eup %1383  ;;  %v430_v40 = vadd.f32 %v1382_v33, %v426_v31  ;;  %v434_v57 = vmul.f32 %v1378_v25, %v370_v47  ;;  %v438_v58 = vmul.f32 3.0, %v1382_v33 }
 0x128   : > { %v425_v41 = vmul.f32 %v1384_v37, %v357_v36  ;;  %v1386_v43 = vpop.eup %1385  ;;  %v369_v42 = vadd.f32 %v365_v49, %v361_v48 }
 0x129   : > { %1391 = vrcp.f32 %v430_v40  ;;  %v437_v63 = vmul.f32 3.0, %v1386_v43  ;;  %v442_v7 = vadd.f32 %v438_v58, %v434_v57 }
 0x12a   : > { %v429_v46 = vadd.f32 %v1386_v43, %v425_v41  ;;  %v433_v62 = vmul.f32 %v1384_v37, %v369_v42 }
 0x12c   : > { %1393 = vrcp.f32 %v429_v46  ;;  %v441_v10 = vadd.f32 %v437_v63, %v433_v62 }
 0x12e   : > { %v1388_v54 = vpop.eup %1387 }
 0x12f   : > { %v446_v3 = vmul.f32 %v1388_v54, %v440_v60 }
 0x130   : > { %v1390_v59 = vpop.eup %1389 }
 0x131   : > { %v444_v6 = vmul.f32 %v1390_v59, %v439_v61  ;;  %v464_v12 = vrot.slane %v446_v3, %v459_v2 }
 0x133   : > { %v1392_v8 = vpop.eup %1391  ;;  %v460_v13 = vrot.slane %v444_v6, %v459_v2 }
 0x134   : > { %v450_v9 = vmul.f32 %v1392_v8, %v442_v7 }
 0x135   : > { %v474_v1 = vsel %vm473_vm2, %v464_v12, %v460_v13 }
 0x136   : > { %v1394_v11 = vpop.eup %1393  ;;  %v472_v15 = vrot.slane %v450_v9, %v459_v2 }
 0x137   : > { %v448_v14 = vmul.f32 %v1394_v11, %v441_v10 }
 0x139   : > { %v468_v16 = vrot.slane %v448_v14, %v459_v2 }
 0x13b   : > { %v476_v0 = vsel %vm475_vm3, %v468_v16, %v474_v1 }
 0x13c   : > { %v478_v17 = vsel %vm477_vm4, %v472_v15, %v476_v0 }
 0x13d   : > { %481 = vst.msk [vmem:[#allocation2] sm:$0xf] %vm480_vm5, %v478_v17 }
 0x13e PF: > { %v1871_v18 = vld [vmem:[%s1786_s22 + $0x10] sm:$0xf]  ;;  %vm490_vm6 = vcmask 257024   ;;  %v1874_v19 = vld [vmem:[%s1786_s22] sm:$0xf]  ;;  %vm1155_vm7 = vcmask 1042434  }
 0x13f   : > { %v519_v5 = vsel %vm490_vm6, %v1871_v18, 0.0  ;;  %v491_v4 = vsel %vm490_vm6, %v1874_v19, 0.0  ;;  %v1881_v20 = vld [vmem:[%s1786_s22 + $0x14] sm:$0xf]  ;;  %v1884_v21 = vld [vmem:[%s1786_s22 + $0x4] sm:$0xf] }
 0x140   : > { %v520_v23 = vrot.slane %v519_v5, 4  ;;  %v492_v25 = vrot.slane %v491_v4, 4  ;;  %v526_v26 = vsel %vm490_vm6, %v1881_v20, 0.0  ;;  %v498_v27 = vsel %vm490_vm6, %v1884_v21, 0.0  ;;  %v1891_v34 = vld [vmem:[%s1786_s22 + $0x8] sm:$0xf] }
 0x141   : > { %v527_v28 = vrot.slane %v526_v26, 4  ;;  %v499_v29 = vrot.slane %v498_v27, 4  ;;  %v1894_v35 = vld [vmem:[%s1786_s22 + $0x1c] sm:$0xf]  ;;  %v505_v24 = vsel %vm490_vm6, %v1891_v34, 0.0  ;;  %vm1153_vm8 = vcmask 1041409  }
 0x142   : > { %v521_v22 = vadd.f32 %v520_v23, %v519_v5  ;;  %v493_v30 = vadd.f32 %v492_v25, %v491_v4  ;;  %v540_v39 = vsel %vm490_vm6, %v1894_v35, 0.0  ;;  %v1901_v50 = vld [vmem:[%s1786_s22 + $0x18] sm:$0xf]  ;;  %v506_v51 = vrot.slane %v505_v24, 4  ;;  %p1269_p1 = scmp.ne.s32.totalorder %s1678_s13, 2 }
 0x143   : > { %v500_v31 = vadd.f32 %v499_v29, %v498_v27  ;;  %v528_v33 = vadd.f32 %v527_v28, %v526_v26  ;;  %v541_v45 = vrot.slane %v540_v39, 4  ;;  %v533_v54 = vsel %vm490_vm6, %v1901_v50, 0.0  ;;  %v1922_v27 = vld [vmem:[%s1786_s22 + $0xc] sm:$0xf] }
 0x144   : > { %v522_v36 = vrot.slane %v521_v22, 2  ;;  %v494_v37 = vrot.slane %v493_v30, 2  ;;  %v534_v60 = vrot.slane %v533_v54, 4  ;;  %v507_v61 = vadd.f32 %v506_v51, %v505_v24 }
 0x145   : > { %v501_v32 = vrot.slane %v500_v31, 2  ;;  %v529_v40 = vrot.slane %v528_v33, 2  ;;  %v542_v57 = vadd.f32 %v541_v45, %v540_v39  ;;  %v512_v28 = vsel %vm490_vm6, %v1922_v27, 0.0 }
 0x146   : > { %v523_v41 = vadd.f32 %v522_v36, %v521_v22  ;;  %v495_v43 = vadd.f32 %v494_v37, %v493_v30  ;;  %v535_v16 = vadd.f32 %v534_v60, %v533_v54  ;;  %v508_v17 = vrot.slane %v507_v61, 2 }
 0x147   : > { %v502_v38 = vadd.f32 %v501_v32, %v500_v31  ;;  %v530_v44 = vadd.f32 %v529_v40, %v528_v33  ;;  %v543_v9 = vrot.slane %v542_v57, 2  ;;  %v513_v40 = vrot.slane %v512_v28, 4 }
 0x148   : > { %v524_v46 = vrot.slane %v523_v41, 1  ;;  %v496_v47 = vrot.slane %v495_v43, 1  ;;  %v536_v29 = vrot.slane %v535_v16, 2  ;;  %v509_v31 = vadd.f32 %v508_v17, %v507_v61 }
 0x149   : > { %v503_v48 = vrot.slane %v502_v38, 1  ;;  %v531_v49 = vrot.slane %v530_v44, 1  ;;  %v544_v5 = vadd.f32 %v543_v9, %v542_v57  ;;  %v514_v51 = vadd.f32 %v513_v40, %v512_v28 }
 0x14a   : > { %v525_v52 = vadd.f32 %v524_v46, %v523_v41  ;;  %v497_v53 = vadd.f32 %v496_v47, %v495_v43  ;;  %v537_v41 = vadd.f32 %v536_v29, %v535_v16  ;;  %vm1157_vm9 = vcmask 1043459  }
 0x14b   : > { %v504_v55 = vadd.f32 %v503_v48, %v502_v38  ;;  %v532_v56 = vadd.f32 %v531_v49, %v530_v44  ;;  %v545_v33 = vrot.slane %v544_v5, 1  ;;  %v510_v38 = vrot.slane %v509_v31, 1 }
 0x14c   : > { %v552_v58 = vmul.f32 0.25, %v525_v52  ;;  %v548_v59 = vmul.f32 0.25, %v497_v53  ;;  %vm1164_vm10 = vcmask 27648   ;;  %vm1179_vm11 = vcmask 0  }
 0x14d   : > { %v1905_v42 = vmul.f32 0.25, %v504_v55  ;;  %v553_v8 = vmul.f32 0.25, %v532_v56  ;;  %v546_v44 = vadd.f32 %v545_v33, %v544_v5  ;;  %v511_v54 = vadd.f32 %v510_v38, %v509_v31 }
 0x14e   : > { %v560_v62 = vsub.f32 %v1871_v18, %v552_v58  ;;  %v556_v63 = vsub.f32 %v1874_v19, %v548_v59  ;;  %v561_v2 = vsub.f32 %v1881_v20, %v552_v58  ;;  %v557_v3 = vsub.f32 %v1884_v21, %v548_v59 }
 0x14f   : > { %v605_v6 = vsub.f32 %v1884_v21, %v1905_v42  ;;  %v604_v7 = vsub.f32 %v1874_v19, %v1905_v42  ;;  %v609_v1 = vsub.f32 %v1881_v20, %v553_v8  ;;  %v608_v0 = vsub.f32 %v1871_v18, %v553_v8 }
 0x150   : > { %v568_v10 = vmul.f32 %v560_v62, %v560_v62  ;;  %v564_v11 = vmul.f32 %v556_v63, %v556_v63  ;;  %v569_v12 = vmul.f32 %v561_v2, %v561_v2  ;;  %v565_v13 = vmul.f32 %v557_v3, %v557_v3 }
 0x151   : > { %v613_v25 = vmul.f32 %v605_v6, %v605_v6  ;;  %v612_v26 = vmul.f32 %v604_v7, %v604_v7  ;;  %v617_v22 = vmul.f32 %v609_v1, %v609_v1  ;;  %v616_v30 = vmul.f32 %v608_v0, %v608_v0 }
 0x152   : > { %v584_v14 = vsel %vm490_vm6, %v568_v10, 0.0  ;;  %v572_v15 = vsel %vm490_vm6, %v564_v11, 0.0  ;;  %v587_v4 = vsel %vm490_vm6, %v569_v12, 0.0  ;;  %v575_v23 = vsel %vm490_vm6, %v565_v13, 0.0 }
 0x153   : > { %585 = vadd.xlane.f32.xlu1 %v584_v14  ;;  %573 = vadd.xlane.f32.xlu0 %v572_v15  ;;  %v623_v36 = vsel %vm490_vm6, %v613_v25, 0.0  ;;  %v620_v37 = vsel %vm490_vm6, %v612_v26, 0.0  ;;  %v562_v39 = vsub.f32 %v1901_v50, %v552_v58  ;;  %v558_v32 = vsub.f32 %v1891_v34, %v548_v59 }
 0x154   : > { %v635_v43 = vsel %vm490_vm6, %v617_v22, 0.0  ;;  %v632_v24 = vsel %vm490_vm6, %v616_v30, 0.0  ;;  %v610_v47 = vsub.f32 %v1901_v50, %v553_v8  ;;  %v606_v48 = vsub.f32 %v1891_v34, %v1905_v42 }
 0x155   : > { %v570_v45 = vmul.f32 %v562_v39, %v562_v39  ;;  %v566_v46 = vmul.f32 %v558_v32, %v558_v32  ;;  %v1935_v49 = vmul.f32 0.25, %v546_v44  ;;  %v563_v52 = vsub.f32 %v1894_v35, %v552_v58 }
 0x156   : > { %v559_v53 = vsub.f32 %v1922_v27, %v548_v59  ;;  %v538_v55 = vrot.slane %v537_v41, 1  ;;  %v618_v60 = vmul.f32 %v610_v47, %v610_v47  ;;  %v614_v61 = vmul.f32 %v606_v48, %v606_v48 }
 0x157   : > { %588 = vadd.xlane.f32.xlu1 %v587_v4  ;;  %576 = vadd.xlane.f32.xlu0 %v575_v23  ;;  %v590_v56 = vsel %vm490_vm6, %v570_v45, 0.0  ;;  %v578_v57 = vsel %vm490_vm6, %v566_v46, 0.0  ;;  %v880_v62 = vsub.f32 %v1871_v18, %v1935_v49  ;;  %v611_v63 = vsub.f32 %v1894_v35, %v553_v8 }
 0x158   : > { %v515_v2 = vrot.slane %v514_v51, 2  ;;  %v1038_v3 = vlaneseq  ;;  %v571_v58 = vmul.f32 %v563_v52, %v563_v52  ;;  %v567_v6 = vmul.f32 %v559_v53, %v559_v53 }
 0x159   : > { %v550_v59 = vmul.f32 0.25, %v511_v54  ;;  %v888_v7 = vmul.f32 %v880_v62, %v880_v62  ;;  %v638_v9 = vsel %vm490_vm6, %v618_v60, 0.0  ;;  %v626_v10 = vsel %vm490_vm6, %v614_v61, 0.0 }
 0x15a   : > { %v607_v11 = vsub.f32 %v1922_v27, %v1905_v42  ;;  %v539_v12 = vadd.f32 %v538_v55, %v537_v41  ;;  %v516_v8 = vadd.f32 %v515_v2, %v514_v51  ;;  %v1951_v14 = vshrl.u32 %v1038_v3, 7 }
 0x15b   : > { %624 = vadd.xlane.f32.xlu1 %v623_v36  ;;  %621 = vadd.xlane.f32.xlu0 %v620_v37  ;;  %v1949_v13 = vsel %vm490_vm6, %v888_v7, 0.0  ;;  %v1120_v15 = vand.u32 127, %v1038_v3  ;;  %v593_v16 = vsel %vm490_vm6, %v571_v58, 0.0  ;;  %v581_v1 = vsel %vm490_vm6, %v567_v6, 0.0 }
 0x15c   : > { %v619_v0 = vmul.f32 %v611_v63, %v611_v63  ;;  %v733_v17 = vsub.f32 %v1884_v21, %v550_v59  ;;  %v615_v5 = vmul.f32 %v607_v11, %v607_v11  ;;  %v732_v42 = vsub.f32 %v1874_v19, %v550_v59 }
 0x15d   : > { %v554_v4 = vmul.f32 0.25, %v539_v12  ;;  %v1958_v23 = vsub.s32 %v1120_v15, %v1951_v14  ;;  %v517_v28 = vrot.slane %v516_v8, 1  ;;  %v734_v36 = vsub.f32 %v1891_v34, %v550_v59 }
 0x15e   : > { %v641_v25 = vsel %vm490_vm6, %v619_v0, 0.0  ;;  %v741_v26 = vmul.f32 %v733_v17, %v733_v17  ;;  %v629_v29 = vsel %vm490_vm6, %v615_v5, 0.0  ;;  %v740_v22 = vmul.f32 %v732_v42, %v732_v42 }
 0x15f   : > { %636 = vadd.xlane.f32.xlu1 %v635_v43  ;;  %633 = vadd.xlane.f32.xlu0 %v632_v24  ;;  %v737_v30 = vsub.f32 %v1881_v20, %v554_v4  ;;  %v736_v31 = vsub.f32 %v1871_v18, %v554_v4  ;;  %v518_v37 = vadd.f32 %v517_v28, %v516_v8  ;;  %v1054_v12 = vsub.s32 2, %v1951_v14 }
 0x160   : > { %v751_v33 = vsel %vm490_vm6, %v741_v26, 0.0  ;;  %v748_v39 = vsel %vm490_vm6, %v740_v22, 0.0  ;;  %v738_v41 = vsub.f32 %v1901_v50, %v554_v4  ;;  %v742_v43 = vmul.f32 %v734_v36, %v734_v36 }
 0x161   : > { %v745_v32 = vmul.f32 %v737_v30, %v737_v30  ;;  %v744_v40 = vmul.f32 %v736_v31, %v736_v31  ;;  %v735_v24 = vsub.f32 %v1922_v27, %v550_v59  ;;  %v551_v38 = vmul.f32 0.25, %v518_v37 }
 0x162   : > { %v746_v45 = vmul.f32 %v738_v41, %v738_v41  ;;  %v739_v46 = vsub.f32 %v1894_v35, %v554_v4  ;;  %v754_v47 = vsel %vm490_vm6, %v742_v43, 0.0  ;;  %v881_v55 = vsub.f32 %v1881_v20, %v1935_v49 }
 0x163   : > { %591 = vadd.xlane.f32.xlu1 %v590_v56  ;;  %579 = vadd.xlane.f32.xlu0 %v578_v57  ;;  %v763_v18 = vsel %vm490_vm6, %v745_v32, 0.0  ;;  %v760_v44 = vsel %vm490_vm6, %v744_v40, 0.0  ;;  %v743_v48 = vmul.f32 %v735_v24, %v735_v24  ;;  %v877_v53 = vsub.f32 %v1884_v21, %v551_v38 }
 0x164   : > { %v766_v51 = vsel %vm490_vm6, %v746_v45, 0.0  ;;  %v747_v52 = vmul.f32 %v739_v46, %v739_v46  ;;  %v876_v54 = vsub.f32 %v1874_v19, %v551_v38  ;;  %v889_v62 = vmul.f32 %v881_v55, %v881_v55 }
 0x165   : > { %v757_v57 = vsel %vm490_vm6, %v743_v48, 0.0  ;;  %v885_v60 = vmul.f32 %v877_v53, %v877_v53  ;;  %v882_v19 = vsub.f32 %v1901_v50, %v1935_v49  ;;  %v878_v2 = vsub.f32 %v1891_v34, %v551_v38 }
 0x166   : > { %v769_v56 = vsel %vm490_vm6, %v747_v52, 0.0  ;;  %v884_v61 = vmul.f32 %v876_v54, %v876_v54  ;;  %v907_v20 = vsel %vm490_vm6, %v889_v62, 0.0  ;;  %v883_v6 = vsub.f32 %v1894_v35, %v1935_v49 }
 0x167   : > { %639 = vadd.xlane.f32.xlu1 %v638_v9  ;;  %627 = vadd.xlane.f32.xlu0 %v626_v10  ;;  %v895_v63 = vsel %vm490_vm6, %v885_v60, 0.0  ;;  %v890_v3 = vmul.f32 %v882_v19, %v882_v19  ;;  %v886_v58 = vmul.f32 %v878_v2, %v878_v2  ;;  %v879_v59 = vsub.f32 %v1922_v27, %v551_v38  ;;  %v1036_v27 = vld [vmem:[#allocation2] sm:$0xf] }
 0x168   : > { %v892_v21 = vsel %vm490_vm6, %v884_v61, 0.0  ;;  %v891_v9 = vmul.f32 %v883_v6, %v883_v6  ;;  %v1047_v35 = vsub.s32 1, %v1951_v14  ;;  %v1055_v8 = vrot.slane %v1036_v27, %v1054_v12 }
 0x169   : > { %v910_v7 = vsel %vm490_vm6, %v890_v3, 0.0  ;;  %v898_v50 = vsel %vm490_vm6, %v886_v58, 0.0  ;;  %v887_v34 = vmul.f32 %v879_v59, %v879_v59  ;;  %v1061_v15 = vsub.s32 3, %v1951_v14 }
 0x16a   : > { %v913_v10 = vsel %vm490_vm6, %v891_v9, 0.0  ;;  %v1048_v49 = vrot.slane %v1036_v27, %v1047_v35  ;;  %v1642_v0 = vmov 0  }
 0x16b   : > { %594 = vadd.xlane.f32.xlu1 %v593_v16  ;;  %582 = vadd.xlane.f32.xlu0 %v581_v1  ;;  %v901_v11 = vsel %vm490_vm6, %v887_v34, 0.0  ;;  %v1062_v1 = vrot.slane %v1036_v27, %v1061_v15 }
 0x16c   : > { %1396 = vset.pattern.permute.xlu1 %v1642_v0  ;;  %1395 = vset.pattern.permute.xlu0 %v1642_v0 }
 0x16f   : > { %642 = vadd.xlane.f32.xlu1 %v641_v25  ;;  %630 = vadd.xlane.f32.xlu0 %v629_v29 }
 0x173   : > { %752 = vadd.xlane.f32.xlu1 %v751_v33  ;;  %749 = vadd.xlane.f32.xlu0 %v748_v39 }
 0x177   : > { %764 = vadd.xlane.f32.xlu1 %v763_v18  ;;  %761 = vadd.xlane.f32.xlu0 %v760_v44 }
 0x17b   : > { %767 = vadd.xlane.f32.xlu1 %v766_v51  ;;  %755 = vadd.xlane.f32.xlu0 %v754_v47 }
 0x17f   : > { %770 = vadd.xlane.f32.xlu1 %v769_v56  ;;  %758 = vadd.xlane.f32.xlu0 %v757_v57 }
 0x183   : > { %896 = vadd.xlane.f32.xlu1 %v895_v63  ;;  %893 = vadd.xlane.f32.xlu0 %v892_v21 }
 0x187   : > { %908 = vadd.xlane.f32.xlu1 %v907_v20  ;;  %905 = vadd.xlane.f32.xlu0 %v1949_v13  ;;  %v1040_v13 = vsub.s32 0, %v1951_v14 }
 0x189   : > { %v1041_v16 = vrot.slane %v1036_v27, %v1040_v13 }
 0x18b   : > { %911 = vadd.xlane.f32.xlu1 %v910_v7  ;;  %899 = vadd.xlane.f32.xlu0 %v898_v50 }
 0x18f   : > { %914 = vadd.xlane.f32.xlu1 %v913_v10  ;;  %902 = vadd.xlane.f32.xlu0 %v901_v11 }
 0x1a0   : > { %1050 = vbcast.lane.b32.xlu1 %v1048_v49, 256 }
 0x1a4   : > { %1057 = vbcast.lane.b32.xlu1 %v1055_v8, 256 }
 0x1a5   : > { %1043 = vbcast.lane.b32.xlu0 %v1041_v16, 256 }
 0x1a8   : > { %1064 = vbcast.lane.b32.xlu1 %v1062_v1, 256 }
 0x1e0   : > { %v586_v17 = vpop.xlane.xlu1 %585  ;;  %v574_v5 = vpop.xlane.xlu0 %573 }
 0x1e1   : > { %v596_v28 = vsub.f32 0.0, %v574_v5  ;;  %v600_v41 = vsub.f32 0.0, %v586_v17 }
 0x1e4   : > { %v589_v42 = vpop.xlane.xlu1 %588  ;;  %v577_v4 = vpop.xlane.xlu0 %576 }
 0x1e5   : > { %v597_v29 = vsub.f32 0.0, %v577_v4  ;;  %v601_v43 = vsub.f32 0.0, %v589_v42 }
 0x1e8   : > { %v625_v25 = vpop.xlane.xlu1 %624  ;;  %v622_v26 = vpop.xlane.xlu0 %621 }
 0x1e9   : > { %v645_v22 = vsub.f32 0.0, %v625_v25  ;;  %v644_v30 = vsub.f32 0.0, %v622_v26 }
 0x1eb   : > { %v1998_v31 = vmax.f32 %v597_v29, %v645_v22  ;;  %v2000_v14 = vmax.f32 %v596_v28, %v644_v30 }
 0x1ec   : > { %v637_v33 = vpop.xlane.xlu1 %636  ;;  %v634_v36 = vpop.xlane.xlu0 %633 }
 0x1ed   : > { %v661_v37 = vsub.f32 %v597_v29, %v1998_v31  ;;  %v685_v39 = vsub.f32 %v645_v22, %v1998_v31  ;;  %v660_v32 = vsub.f32 %v596_v28, %v2000_v14  ;;  %v684_v40 = vsub.f32 %v644_v30, %v2000_v14 }
 0x1ee   : > { %v649_v24 = vsub.f32 0.0, %v637_v33  ;;  %v648_v38 = vsub.f32 0.0, %v634_v36 }
 0x1ef   : > { %v670_v18 = vmul.f32 1.442695, %v661_v37  ;;  %v694_v44 = vmul.f32 1.442695, %v685_v39  ;;  %v668_v45 = vmul.f32 1.442695, %v660_v32 }
 0x1f0   : > { %v2006_v46 = vmax.f32 %v601_v43, %v649_v24  ;;  %v2008_v47 = vmax.f32 %v600_v41, %v648_v38  ;;  %v592_v48 = vpop.xlane.xlu1 %591  ;;  %v580_v51 = vpop.xlane.xlu0 %579  ;;  %v692_v52 = vmul.f32 1.442695, %v684_v40 }
 0x1f1   : > { %1397 = vpow2.f32 %v670_v18  ;;  %v602_v61 = vsub.f32 0.0, %v592_v48  ;;  %v598_v21 = vsub.f32 0.0, %v580_v51 }
 0x1f2   : > { %1399 = vpow2.f32 %v694_v44  ;;  %v665_v53 = vsub.f32 %v601_v43, %v2006_v46  ;;  %v689_v54 = vsub.f32 %v649_v24, %v2006_v46  ;;  %v664_v55 = vsub.f32 %v600_v41, %v2008_v47 }
 0x1f3   : > { %1401 = vpow2.f32 %v668_v45  ;;  %v688_v60 = vsub.f32 %v648_v38, %v2008_v47 }
 0x1f4   : > { %v678_v56 = vmul.f32 1.442695, %v665_v53  ;;  %v702_v57 = vmul.f32 1.442695, %v689_v54  ;;  %v640_v62 = vpop.xlane.xlu1 %639  ;;  %v628_v63 = vpop.xlane.xlu0 %627  ;;  %1403 = vpow2.f32 %v692_v52  ;;  %v676_v20 = vmul.f32 1.442695, %v664_v55 }
 0x1f5   : > { %v650_v19 = vsub.f32 0.0, %v640_v62  ;;  %v646_v2 = vsub.f32 0.0, %v628_v63  ;;  %v700_v6 = vmul.f32 1.442695, %v688_v60 }
 0x1f6   : > { %1405 = vpow2.f32 %v678_v56 }
 0x1f7   : > { %1407 = vpow2.f32 %v702_v57  ;;  %v2014_v3 = vmax.f32 %v602_v61, %v650_v19  ;;  %v2016_v58 = vmax.f32 %v598_v21, %v646_v2 }
 0x1f8   : > { %v595_v59 = vpop.xlane.xlu1 %594  ;;  %v583_v7 = vpop.xlane.xlu0 %582  ;;  %1409 = vpow2.f32 %v676_v20 }
 0x1f9   : > { %v666_v50 = vsub.f32 %v602_v61, %v2014_v3  ;;  %v690_v9 = vsub.f32 %v650_v19, %v2014_v3  ;;  %v662_v34 = vsub.f32 %v598_v21, %v2016_v58  ;;  %v686_v10 = vsub.f32 %v646_v2, %v2016_v58 }
 0x1fa   : > { %1411 = vpow2.f32 %v700_v6  ;;  %v603_v16 = vsub.f32 0.0, %v595_v59  ;;  %v599_v1 = vsub.f32 0.0, %v583_v7 }
 0x1fb   : > { %v1398_v11 = vpop.eup %1397  ;;  %v680_v35 = vmul.f32 1.442695, %v666_v50  ;;  %v704_v49 = vmul.f32 1.442695, %v690_v9  ;;  %v672_v5 = vmul.f32 1.442695, %v662_v34 }
 0x1fc   : > { %v1400_v27 = vpop.eup %1399  ;;  %v643_v12 = vpop.xlane.xlu1 %642  ;;  %v717_v8 = vmul.f32 0.0, %v1398_v11  ;;  %v696_v42 = vmul.f32 1.442695, %v686_v10 }
 0x1fd   : > { %v631_v13 = vpop.xlane.xlu0 %630  ;;  %v1402_v15 = vpop.eup %1401  ;;  %v651_v0 = vsub.f32 0.0, %v643_v12  ;;  %1413 = vpow2.f32 %v680_v35  ;;  %v2026_v22 = vadd.f32 %v1400_v27, %v1398_v11 }
 0x1fe   : > { %v647_v17 = vsub.f32 0.0, %v631_v13  ;;  %v1404_v4 = vpop.eup %1403  ;;  %v716_v28 = vmul.f32 0.0, %v1402_v15  ;;  %1415 = vpow2.f32 %v704_v49  ;;  %v2028_v36 = vadd.f32 %v1400_v27, %v717_v8 }
 0x1ff   : > { %v2022_v25 = vmax.f32 %v603_v16, %v651_v0  ;;  %v2034_v43 = vadd.f32 %v1404_v4, %v1402_v15  ;;  %1417 = vpow2.f32 %v672_v5 }
 0x200   : > { %v2024_v26 = vmax.f32 %v599_v1, %v647_v17  ;;  %v1406_v29 = vpop.eup %1405  ;;  %v753_v30 = vpop.xlane.xlu1 %752  ;;  %1419 = vpow2.f32 %v696_v42  ;;  %v2036_v45 = vadd.f32 %v1404_v4, %v716_v28 }
 0x201   : > { %v750_v33 = vpop.xlane.xlu0 %749  ;;  %v1408_v37 = vpop.eup %1407  ;;  %v667_v39 = vsub.f32 %v603_v16, %v2022_v25  ;;  %v691_v32 = vsub.f32 %v651_v0, %v2022_v25  ;;  %v773_v24 = vsub.f32 0.0, %v753_v30  ;;  %v721_v59 = vmul.f32 0.0, %v1406_v29 }
 0x202   : > { %v663_v40 = vsub.f32 %v599_v1, %v2024_v26  ;;  %v687_v41 = vsub.f32 %v647_v17, %v2024_v26  ;;  %v772_v38 = vsub.f32 0.0, %v750_v33  ;;  %v2038_v48 = vadd.f32 %v1408_v37, %v1406_v29  ;;  %v1410_v56 = vpop.eup %1409 }
 0x203   : > { %v682_v18 = vmul.f32 1.442695, %v667_v39  ;;  %v706_v44 = vmul.f32 1.442695, %v691_v32  ;;  %v2041_v52 = vmax.f32 %v1998_v31, %v773_v24  ;;  %v2073_v16 = vadd.f32 %v1408_v37, %v721_v59 }
 0x204   : > { %v674_v51 = vmul.f32 1.442695, %v663_v40  ;;  %v2044_v53 = vmax.f32 %v2000_v14, %v772_v38  ;;  %v765_v54 = vpop.xlane.xlu1 %764  ;;  %v698_v57 = vmul.f32 1.442695, %v687_v41  ;;  %v2046_v62 = vpop.eup %1411 }
 0x205   : > { %v762_v55 = vpop.xlane.xlu0 %761  ;;  %1421 = vpow2.f32 %v682_v18  ;;  %v777_v60 = vsub.f32 0.0, %v765_v54  ;;  %v789_v63 = vsub.f32 %v1998_v31, %v2041_v52  ;;  %v813_v21 = vsub.f32 %v773_v24, %v2041_v52 }
 0x206   : > { %v776_v61 = vsub.f32 0.0, %v762_v55  ;;  %1423 = vpow2.f32 %v706_v44  ;;  %v788_v19 = vsub.f32 %v2000_v14, %v2044_v53  ;;  %v812_v2 = vsub.f32 %v772_v38, %v2044_v53 }
 0x207   : > { %v2055_v20 = vmax.f32 %v2006_v46, %v777_v60  ;;  %1425 = vpow2.f32 %v674_v51  ;;  %v798_v7 = vmul.f32 1.442695, %v789_v63  ;;  %v822_v50 = vmul.f32 1.442695, %v813_v21  ;;  %v2060_v10 = vpop.eup %1413 }
 0x208   : > { %v2058_v6 = vmax.f32 %v2008_v47, %v776_v61  ;;  %v796_v9 = vmul.f32 1.442695, %v788_v19  ;;  %v768_v34 = vpop.xlane.xlu1 %767  ;;  %1427 = vpow2.f32 %v698_v57  ;;  %v820_v11 = vmul.f32 1.442695, %v812_v2  ;;  %v2065_v27 = vpop.eup %1415 }
 0x209   : > { %v756_v31 = vpop.xlane.xlu0 %755  ;;  %v793_v14 = vsub.f32 %v2006_v46, %v2055_v20  ;;  %v817_v35 = vsub.f32 %v777_v60, %v2055_v20  ;;  %v2068_v49 = vadd.f32 %v2046_v62, %v1410_v56  ;;  %1429 = vpow2.f32 %v798_v7  ;;  %v2075_v1 = vpop.eup %1417 }
 0x20a   : > { %v792_v12 = vsub.f32 %v2008_v47, %v2058_v6  ;;  %v778_v13 = vsub.f32 0.0, %v768_v34  ;;  %1431 = vpow2.f32 %v822_v50  ;;  %v816_v15 = vsub.f32 %v776_v61, %v2058_v6  ;;  %v2080_v4 = vpop.eup %1419 }
 0x20b   : > { %v806_v8 = vmul.f32 1.442695, %v793_v14  ;;  %1433 = vpow2.f32 %v796_v9  ;;  %v830_v46 = vmul.f32 1.442695, %v817_v35  ;;  %v774_v47 = vsub.f32 0.0, %v756_v31 }
 0x20c   : > { %v804_v0 = vmul.f32 1.442695, %v792_v12  ;;  %v2078_v17 = vmax.f32 %v2014_v3, %v778_v13  ;;  %v771_v5 = vpop.xlane.xlu1 %770  ;;  %1435 = vpow2.f32 %v820_v11  ;;  %v2084_v30 = vadd.f32 %v2065_v27, %v2060_v10 }
 0x20d   : > { %v759_v42 = vpop.xlane.xlu0 %758  ;;  %v779_v28 = vsub.f32 0.0, %v771_v5  ;;  %1437 = vpow2.f32 %v806_v8  ;;  %v2092_v32 = vmax.f32 %v2016_v58, %v774_v47  ;;  %v720_v24 = vmul.f32 0.0, %v1410_v56 }
 0x20e   : > { %v775_v29 = vsub.f32 0.0, %v759_v42  ;;  %v794_v33 = vsub.f32 %v2014_v3, %v2078_v17  ;;  %v818_v37 = vsub.f32 %v778_v13, %v2078_v17  ;;  %v2104_v18 = vadd.f32 %v2080_v4, %v2075_v1 }
 0x20f   : > { %v2089_v39 = vpop.eup %1421  ;;  %v2095_v40 = vmax.f32 %v2022_v25, %v779_v28  ;;  %1439 = vpow2.f32 %v804_v0  ;;  %v828_v3 = vmul.f32 1.442695, %v816_v15  ;;  %v790_v57 = vsub.f32 %v2016_v58, %v2092_v32 }
 0x210   : > { %v2098_v41 = vmax.f32 %v2024_v26, %v775_v29  ;;  %v2100_v38 = vpop.eup %1423  ;;  %v808_v44 = vmul.f32 1.442695, %v794_v33  ;;  %v897_v51 = vpop.xlane.xlu1 %896  ;;  %1441 = vpow2.f32 %v830_v46  ;;  %v832_v55 = vmul.f32 1.442695, %v818_v37 }
 0x211   : > { %v894_v54 = vpop.xlane.xlu0 %893  ;;  %v814_v60 = vsub.f32 %v774_v47, %v2092_v32  ;;  %v2109_v61 = vpop.eup %1425  ;;  %v795_v56 = vsub.f32 %v2022_v25, %v2095_v40  ;;  %v819_v63 = vsub.f32 %v779_v28, %v2095_v40  ;;  %v2120_v2 = vadd.f32 %v2100_v38, %v2089_v39 }
 0x212   : > { %1443 = vpow2.f32 %v808_v44  ;;  %v791_v21 = vsub.f32 %v2024_v26, %v2098_v41  ;;  %v2116_v19 = vpop.eup %1427  ;;  %v800_v58 = vmul.f32 1.442695, %v790_v57  ;;  %v2123_v7 = vadd.f32 %v2046_v62, %v720_v24 }
 0x213   : > { %v824_v59 = vmul.f32 1.442695, %v814_v60  ;;  %v2125_v50 = vpop.eup %1429  ;;  %1445 = vpow2.f32 %v828_v3  ;;  %v810_v25 = vmul.f32 1.442695, %v795_v56  ;;  %v834_v9 = vmul.f32 1.442695, %v819_v63 }
 0x214   : > { %v815_v34 = vsub.f32 %v775_v29, %v2098_v41  ;;  %v909_v31 = vpop.xlane.xlu1 %908  ;;  %v2128_v11 = vpop.eup %1431  ;;  %v837_v14 = vmul.f32 %v2125_v50, %v2026_v22  ;;  %1447 = vpow2.f32 %v800_v58  ;;  %v917_v35 = vsub.f32 0.0, %v897_v51 }
 0x215   : > { %v906_v26 = vpop.xlane.xlu0 %905  ;;  %v916_v12 = vsub.f32 0.0, %v894_v54  ;;  %v2132_v13 = vpop.eup %1433  ;;  %1449 = vpow2.f32 %v832_v55  ;;  %v802_v62 = vmul.f32 1.442695, %v791_v21  ;;  %v921_v8 = vsub.f32 0.0, %v909_v31 }
 0x216   : > { %v920_v15 = vsub.f32 0.0, %v906_v26  ;;  %v2134_v46 = vpop.eup %1435  ;;  %v836_v0 = vmul.f32 %v2132_v13, %v2034_v43  ;;  %1451 = vpow2.f32 %v824_v59  ;;  %v826_v5 = vmul.f32 1.442695, %v815_v34 }
 0x217   : > { %v925_v42 = vmax.f32 %v2041_v52, %v917_v35  ;;  %v2139_v47 = vpop.eup %1437  ;;  %v2143_v22 = vadd.f32 %v2116_v19, %v2109_v61  ;;  %1453 = vpow2.f32 %v810_v25  ;;  %v924_v28 = vmax.f32 %v2044_v53, %v916_v12 }
 0x218   : > { %v929_v29 = vmax.f32 %v2055_v20, %v921_v8  ;;  %v912_v33 = vpop.xlane.xlu1 %911  ;;  %v2148_v37 = vadd.f32 %v2128_v11, %v837_v14  ;;  %1455 = vpow2.f32 %v834_v9  ;;  %v928_v24 = vmax.f32 %v2058_v6, %v920_v15 }
 0x219   : > { %v933_v43 = vsub.f32 %v2041_v52, %v925_v42  ;;  %v900_v3 = vpop.xlane.xlu0 %899  ;;  %v2152_v44 = vpop.eup %1439  ;;  %1457 = vpow2.f32 %v802_v62  ;;  %v957_v51 = vsub.f32 %v917_v35, %v925_v42  ;;  %v932_v54 = vsub.f32 %v2044_v53, %v924_v28 }
 0x21a   : > { %v956_v55 = vsub.f32 %v916_v12, %v924_v28  ;;  %v2155_v57 = vpop.eup %1441  ;;  %v2158_v60 = vadd.f32 %v2134_v46, %v836_v0  ;;  %1459 = vpow2.f32 %v826_v5  ;;  %v937_v63 = vsub.f32 %v2055_v20, %v929_v29 }
 0x21b   : > { %v942_v56 = vmul.f32 1.442695, %v933_v43  ;;  %v966_v21 = vmul.f32 1.442695, %v957_v51  ;;  %v940_v58 = vmul.f32 1.442695, %v932_v54  ;;  %v961_v25 = vsub.f32 %v921_v8, %v929_v29 }
 0x21c   : > { %v2161_v52 = vpop.eup %1443  ;;  %v964_v59 = vmul.f32 1.442695, %v956_v55  ;;  %v841_v9 = vmul.f32 %v2139_v47, %v2038_v48  ;;  %v840_v53 = vmul.f32 %v2152_v44, %v2068_v49  ;;  %v950_v34 = vmul.f32 1.442695, %v937_v63  ;;  %v915_v35 = vpop.xlane.xlu1 %914 }
 0x21d   : > { %1461 = vpow2.f32 %v942_v56  ;;  %v2167_v31 = vpop.eup %1445  ;;  %v974_v26 = vmul.f32 1.442695, %v961_v25  ;;  %v936_v20 = vsub.f32 %v2058_v6, %v928_v24  ;;  %v960_v14 = vsub.f32 %v920_v15, %v928_v24  ;;  %v903_v0 = vpop.xlane.xlu0 %902 }
 0x21e   : > { %1463 = vpow2.f32 %v966_v21  ;;  %v2170_v12 = vpop.eup %1447  ;;  %v842_v62 = vmul.f32 %v2161_v52, %v2084_v30  ;;  %v922_v48 = vsub.f32 0.0, %v912_v33  ;;  %v918_v8 = vsub.f32 0.0, %v900_v3 }
 0x21f   : > { %1465 = vpow2.f32 %v940_v58  ;;  %v2174_v49 = vpop.eup %1449  ;;  %v838_v5 = vmul.f32 %v2170_v12, %v2104_v18  ;;  %v948_v42 = vmul.f32 1.442695, %v936_v20  ;;  %v972_v28 = vmul.f32 1.442695, %v960_v14 }
 0x220   : > { %1467 = vpow2.f32 %v964_v59  ;;  %v2178_v6 = vpop.eup %1451  ;;  %v930_v15 = vmax.f32 %v2078_v17, %v922_v48  ;;  %v926_v29 = vmax.f32 %v2092_v32, %v918_v8  ;;  %v923_v30 = vsub.f32 0.0, %v915_v35 }
 0x221   : > { %1469 = vpow2.f32 %v950_v34  ;;  %v2182_v43 = vpop.eup %1453  ;;  %v849_v33 = vadd.f32 %v2155_v57, %v841_v9  ;;  %v848_v24 = vadd.f32 %v2167_v31, %v840_v53  ;;  %v919_v3 = vsub.f32 0.0, %v903_v0 }
 0x222   : > { %1471 = vpow2.f32 %v974_v26  ;;  %v2186_v18 = vpop.eup %1455  ;;  %v938_v51 = vsub.f32 %v2078_v17, %v930_v15  ;;  %v962_v54 = vsub.f32 %v922_v48, %v930_v15  ;;  %v934_v55 = vsub.f32 %v2092_v32, %v926_v29 }
 0x223   : > { %1473 = vpow2.f32 %v948_v42  ;;  %v2190_v56 = vpop.eup %1457  ;;  %v2193_v63 = vadd.f32 %v2174_v49, %v842_v62  ;;  %v2196_v21 = vadd.f32 %v2178_v6, %v838_v5  ;;  %v958_v58 = vsub.f32 %v918_v8, %v926_v29 }
 0x224   : > { %1475 = vpow2.f32 %v972_v28  ;;  %v2198_v59 = vpop.eup %1459  ;;  %v952_v25 = vmul.f32 1.442695, %v938_v51  ;;  %v976_v9 = vmul.f32 1.442695, %v962_v54  ;;  %v944_v53 = vmul.f32 1.442695, %v934_v55 }
 0x225   : > { %v931_v17 = vmax.f32 %v2095_v40, %v923_v30  ;;  %v843_v32 = vmul.f32 %v2182_v43, %v2120_v2  ;;  %v968_v34 = vmul.f32 1.442695, %v958_v58  ;;  %v927_v26 = vmax.f32 %v2098_v41, %v919_v3 }
 0x226   : > { %v857_v20 = vmul.f32 %v2139_v47, %v2073_v16  ;;  %1477 = vpow2.f32 %v952_v25  ;;  %v865_v48 = vmul.f32 2.0, %v2155_v57  ;;  %v839_v54 = vmul.f32 %v2190_v56, %v2143_v22 }
 0x227   : > { %v1462_v14 = vpop.eup %1461  ;;  %v939_v35 = vsub.f32 %v2095_v40, %v931_v17  ;;  %v963_v62 = vsub.f32 %v923_v30, %v931_v17  ;;  %1479 = vpow2.f32 %v976_v9  ;;  %v935_v5 = vsub.f32 %v2098_v41, %v927_v26 }
 0x228   : > { %v1464_v8 = vpop.eup %1463  ;;  %v981_v0 = vmul.f32 %v1462_v14, %v2148_v37  ;;  %v959_v2 = vsub.f32 %v919_v3, %v927_v26  ;;  %1481 = vpow2.f32 %v944_v53  ;;  %v873_v29 = vadd.f32 %v865_v48, %v857_v20 }
 0x229   : > { %v1466_v42 = vpop.eup %1465  ;;  %v954_v28 = vmul.f32 1.442695, %v939_v35  ;;  %v978_v15 = vmul.f32 1.442695, %v963_v62  ;;  %1483 = vpow2.f32 %v968_v34  ;;  %v946_v40 = vmul.f32 1.442695, %v935_v5 }
 0x22a   : > { %v1468_v16 = vpop.eup %1467  ;;  %v989_v47 = vadd.f32 %v1464_v8, %v981_v0  ;;  %v980_v51 = vmul.f32 %v1466_v42, %v2158_v60  ;;  %v970_v57 = vmul.f32 1.442695, %v959_v2  ;;  %v853_v37 = vmul.f32 %v2125_v50, %v2028_v36 }
 0x22b   : > { %v1470_v30 = vpop.eup %1469  ;;  %1485 = vpow2.f32 %v954_v28  ;;  %v861_v41 = vmul.f32 2.0, %v2128_v11  ;;  %v1005_v20 = vmul.f32 3.0, %v1464_v8  ;;  %v852_v50 = vmul.f32 %v2132_v13, %v2036_v45 }
 0x22c   : > { %v1472_v3 = vpop.eup %1471  ;;  %v988_v55 = vadd.f32 %v1468_v16, %v980_v51  ;;  %v985_v58 = vmul.f32 %v1470_v30, %v849_v33  ;;  %1487 = vpow2.f32 %v978_v15  ;;  %v1001_v60 = vmul.f32 %v1470_v30, %v873_v29 }
 0x22d   : > { %v1474_v25 = vpop.eup %1473  ;;  %1489 = vpow2.f32 %v946_v40  ;;  %v1009_v9 = vmul.f32 3.0, %v1472_v3  ;;  %v869_v53 = vadd.f32 %v861_v41, %v853_v37  ;;  %v856_v11 = vmul.f32 %v2152_v44, %v2123_v7 }
 0x22e   : > { %v1476_v17 = vpop.eup %1475  ;;  %v993_v34 = vadd.f32 %v1472_v3, %v985_v58  ;;  %v984_v26 = vmul.f32 %v1474_v25, %v848_v24  ;;  %1491 = vpow2.f32 %v970_v57  ;;  %v860_v33 = vmul.f32 2.0, %v2134_v46  ;;  %v1051_v58 = vpop.permute.xlu1 %1050 }
 0x22f   : > { %v997_v36 = vmul.f32 %v1462_v14, %v869_v53  ;;  %1493 = vrcp.f32 %v989_v47  ;;  %v864_v35 = vmul.f32 2.0, %v2167_v31  ;;  %v851_v48 = vadd.f32 %v2186_v18, %v843_v32 }
 0x230   : > { %v992_v22 = vadd.f32 %v1476_v17, %v984_v26  ;;  %1495 = vrcp.f32 %v993_v34  ;;  %v1478_v62 = vpop.eup %1477  ;;  %v847_v24 = vadd.f32 %v2198_v59, %v839_v54  ;;  %v1017_v8 = vadd.f32 %v1009_v9, %v1001_v60 }
 0x231   : > { %1497 = vrcp.f32 %v988_v55  ;;  %v1480_v14 = vpop.eup %1479  ;;  %v986_v0 = vmul.f32 %v1478_v62, %v2193_v63  ;;  %v1013_v45 = vadd.f32 %v1005_v20, %v997_v36  ;;  %v1004_v13 = vmul.f32 3.0, %v1468_v16  ;;  %v1044_v20 = vpop.permute.xlu0 %1043 }
 0x232   : > { %1499 = vrcp.f32 %v992_v22  ;;  %v1482_v7 = vpop.eup %1481  ;;  %v868_v44 = vadd.f32 %v860_v33, %v852_v50  ;;  %v872_v5 = vadd.f32 %v864_v35, %v856_v11  ;;  %v722_v46 = vmul.f32 0.0, %v2060_v10 }
 0x233   : > { %v718_v31 = vmul.f32 0.0, %v2075_v1  ;;  %v1484_v2 = vpop.eup %1483  ;;  %v994_v28 = vadd.f32 %v1480_v14, %v986_v0  ;;  %v982_v32 = vmul.f32 %v1482_v7, %v2196_v21  ;;  %v1008_v15 = vmul.f32 3.0, %v1476_v17 }
 0x234   : > { %v866_v29 = vmul.f32 2.0, %v2174_v49  ;;  %v996_v51 = vmul.f32 %v1466_v42, %v868_v44  ;;  %v1000_v63 = vmul.f32 %v1474_v25, %v872_v5  ;;  %v730_v16 = vadd.f32 %v2065_v27, %v722_v46 }
 0x235   : > { %v1486_v47 = vpop.eup %1485  ;;  %v726_v40 = vadd.f32 %v2080_v4, %v718_v31  ;;  %v990_v57 = vadd.f32 %v1484_v2, %v982_v32  ;;  %v1010_v10 = vmul.f32 3.0, %v1480_v14  ;;  %v862_v1 = vmul.f32 2.0, %v2178_v6 }
 0x236   : > { %v1488_v30 = vpop.eup %1487  ;;  %v987_v37 = vmul.f32 %v1486_v47, %v851_v48  ;;  %v858_v3 = vmul.f32 %v2161_v52, %v730_v16  ;;  %1501 = vrcp.f32 %v994_v28  ;;  %v723_v49 = vmul.f32 0.0, %v2089_v39 }
 0x237   : > { %v1490_v41 = vpop.eup %1489  ;;  %v854_v21 = vmul.f32 %v2170_v12, %v726_v40  ;;  %v1006_v27 = vmul.f32 3.0, %v1484_v2  ;;  %1503 = vrcp.f32 %v990_v57  ;;  %v1012_v25 = vadd.f32 %v1004_v13, %v996_v51 }
 0x238   : > { %v1492_v42 = vpop.eup %1491  ;;  %v995_v54 = vadd.f32 %v1488_v30, %v987_v37  ;;  %v983_v55 = vmul.f32 %v1490_v41, %v847_v24  ;;  %v1016_v60 = vadd.f32 %v1008_v15, %v1000_v63  ;;  %v731_v9 = vadd.f32 %v2100_v38, %v723_v49 }
 0x239   : > { %v1494_v4 = vpop.eup %1493  ;;  %v867_v6 = vmul.f32 2.0, %v2186_v18  ;;  %v874_v17 = vadd.f32 %v866_v29, %v858_v3  ;;  %v719_v12 = vmul.f32 0.0, %v2109_v61  ;;  %v870_v36 = vadd.f32 %v862_v1, %v854_v21 }
 0x23a   : > { %v1496_v53 = vpop.eup %1495  ;;  %v1023_v52 = vmul.f32 %v1494_v4, %v1013_v45  ;;  %1505 = vrcp.f32 %v995_v54  ;;  %v991_v34 = vadd.f32 %v1492_v42, %v983_v55  ;;  %v859_v50 = vmul.f32 %v2182_v43, %v731_v9  ;;  %v1058_v45 = vpop.permute.xlu1 %1057 }
 0x23b   : > { %v1498_v39 = vpop.eup %1497  ;;  %v1031_v26 = vmul.f32 %v1496_v53, %v1017_v8  ;;  %v1002_v35 = vmul.f32 %v1478_v62, %v874_v17  ;;  %v727_v38 = vadd.f32 %v2116_v19, %v719_v12  ;;  %v998_v24 = vmul.f32 %v1482_v7, %v870_v36 }
 0x23c   : > { %v1500_v11 = vpop.eup %1499  ;;  %v1071_v22 = vsub.f32 %v1023_v52, %v1051_v58  ;;  %v1021_v33 = vmul.f32 %v1498_v39, %v1012_v25  ;;  %v863_v14 = vmul.f32 2.0, %v2198_v59  ;;  %v875_v13 = vadd.f32 %v867_v6, %v859_v50 }
 0x23d   : > { %v1075_v18 = vsub.f32 %v1031_v26, %v1051_v58  ;;  %v1029_v48 = vmul.f32 %v1500_v11, %v1016_v60  ;;  %v855_v8 = vmul.f32 %v2190_v56, %v727_v38  ;;  %v1011_v5 = vmul.f32 3.0, %v1488_v30 }
 0x23e   : > { %v1080_v0 = vmul.f32 %v1071_v22, %v1071_v22  ;;  %v1070_v61 = vsub.f32 %v1021_v33, %v1044_v20  ;;  %1507 = vrcp.f32 %v991_v34  ;;  %v1018_v46 = vadd.f32 %v1010_v10, %v1002_v35  ;;  %v1065_v56 = vpop.permute.xlu1 %1064 }
 0x23f   : > { %v1074_v44 = vsub.f32 %v1029_v48, %v1044_v20  ;;  %v1003_v62 = vmul.f32 %v1486_v47, %v875_v13  ;;  %v1014_v2 = vadd.f32 %v1006_v27, %v998_v24  ;;  %v1084_v7 = vmul.f32 %v1075_v18, %v1075_v18 }
 0x240   : > { %v1079_v43 = vmul.f32 %v1070_v61, %v1070_v61  ;;  %1099 = vperm.xlu1 %1396, %v1080_v0   ;;  %v1502_v31 = vpop.eup %1501  ;;  %v871_v32 = vadd.f32 %v863_v14, %v855_v8  ;;  %v1007_v40 = vmul.f32 3.0, %v1492_v42  ;;  %v1078_v8 = vld [vmem:[#allocation3] sm:$0x1] }
 0x241   : > { %v1083_v19 = vmul.f32 %v1074_v44, %v1074_v44  ;;  %v1504_v28 = vpop.eup %1503  ;;  %v1033_v59 = vmul.f32 %v1502_v31, %v1018_v46  ;;  %v1019_v29 = vadd.f32 %v1011_v5, %v1003_v62 }
 0x242   : > { %1096 = vperm.xlu0 %1395, %v1079_v43   ;;  %v1025_v15 = vmul.f32 %v1504_v28, %v1014_v2  ;;  %v999_v16 = vmul.f32 %v1490_v41, %v871_v32 }
 0x243   : > { %v1076_v63 = vsub.f32 %v1033_v59, %v1058_v45 }
 0x244   : > { %v1506_v51 = vpop.eup %1505  ;;  %1108 = vperm.xlu1 %1396, %v1083_v19   ;;  %v1072_v30 = vsub.f32 %v1025_v15, %v1058_v45  ;;  %v1015_v1 = vadd.f32 %v1007_v40, %v999_v16 }
 0x245   : > { %v1035_v57 = vmul.f32 %v1506_v51, %v1019_v29  ;;  %v1085_v37 = vmul.f32 %v1076_v63, %v1076_v63 }
 0x246   : > { %1111 = vperm.xlu0 %1395, %v1084_v7   ;;  %v1081_v47 = vmul.f32 %v1072_v30, %v1072_v30 }
 0x247   : > { %v1077_v10 = vsub.f32 %v1035_v57, %v1065_v56 }
 0x248   : > { %v1508_v3 = vpop.eup %1507  ;;  %1102 = vperm.xlu1 %1396, %v1081_v47  }
 0x249   : > { %v1027_v21 = vmul.f32 %v1508_v3, %v1015_v1  ;;  %v1086_v49 = vmul.f32 %v1077_v10, %v1077_v10 }
 0x24a   : > { %1114 = vperm.xlu0 %1395, %v1085_v37  }
 0x24b   : > { %v1073_v54 = vsub.f32 %v1027_v21, %v1065_v56 }
 0x24d   : > { %v1082_v55 = vmul.f32 %v1073_v54, %v1073_v54 }
 0x24e   : > { %1117 = vperm.xlu0 %1395, %v1086_v49  }
 0x24f   : > { %1105 = vperm.xlu1 %1396, %v1082_v55  }
 0x2bf   : > { %v1100_v27 = vpop.permute.xlu1 %1099 }
 0x2c0   : > { %v1128_v53 = vrot.slane %v1100_v27, %v1958_v23 }
 0x2c1   : > { %v1097_v4 = vpop.permute.xlu0 %1096 }
 0x2c2   : > { %v1124_v52 = vrot.slane %v1097_v4, %v1958_v23 }
 0x2c3   : > { %v1109_v41 = vpop.permute.xlu1 %1108 }
 0x2c4   : > { %v1140_v60 = vrot.slane %v1109_v41, %v1958_v23  ;;  %v1154_v36 = vsel %vm1153_vm8, %v1128_v53, %v1124_v52 }
 0x2c5   : > { %v1112_v42 = vpop.permute.xlu0 %1111 }
 0x2c6   : > { %v1144_v9 = vrot.slane %v1112_v42, %v1958_v23 }
 0x2c7   : > { %v1103_v58 = vpop.permute.xlu1 %1102 }
 0x2c8   : > { %v1132_v17 = vrot.slane %v1103_v58, %v1958_v23  ;;  %v1159_v39 = vsel %vm1153_vm8, %v1144_v9, %v1140_v60 }
 0x2c9   : > { %v1115_v25 = vpop.permute.xlu0 %1114 }
 0x2ca   : > { %v1148_v6 = vrot.slane %v1115_v25, %v1958_v23  ;;  %v1156_v22 = vsel %vm1155_vm7, %v1132_v17, %v1154_v36 }
 0x2cc   : > { %v1160_v26 = vsel %vm1155_vm7, %v1148_v6, %v1159_v39 }
 0x2cd   : > { %v1118_v12 = vpop.permute.xlu0 %1117 }
 0x2ce   : > { %v1152_v34 = vrot.slane %v1118_v12, %v1958_v23  ;;  %v1106_v20 = vpop.permute.xlu1 %1105 }
 0x2cf   : > { %v1136_v50 = vrot.slane %v1106_v20, %v1958_v23 }
 0x2d0   : > { %v1161_v11 = vsel %vm1157_vm9, %v1152_v34, %v1160_v26 }
 0x2d1   : > { %v1166_v33 = vsel %vm1164_vm10, %v1161_v11, 0.0  ;;  %v1158_v35 = vsel %vm1157_vm9, %v1136_v50, %v1156_v22 }
 0x2d2   : > { %v1165_v38 = vsel %vm1164_vm10, %v1158_v35, 0.0 }
 0x2d3   : > { %v1167_v18 = vadd.f32 %v1166_v33, %v1165_v38 }
 0x2d5   : > { %1168 = vadd.xlane.f32.xlu1 %v1167_v18 }
 0x362   : > { %v1169_v48 = vpop.xlane.xlu1 %1168 }
 0x363   : > { %v1170_v24 = vrot.slane %v1169_v48, 4 }
 0x365   : > { %v1171_v14 = vadd.f32 %v1170_v24, %v1169_v48 }
 0x367   : > { %v1172_v0 = vrot.slane %v1171_v14, 2 }
 0x369   : > { %v1173_v61 = vadd.f32 %v1172_v0, %v1171_v14 }
 0x36b   : > { %v1174_v45 = vrot.slane %v1173_v61, 1 }
 0x36d   : > { %v1175_v13 = vadd.f32 %v1174_v45, %v1173_v61 }
 0x36f   : > { %1276 = vpush %v1175_v13 }
 0x39e   : > { %1184 = sbr.rel (%p1269_p1) target bundleno = 943 (0x3af), region = 44 }
 0x3a0   : > { %s1277_s14 = spop %1276 }
 0x3a1   : > { %v1177_v44 = vstv %s1277_s14 }
 0x3a2   : > { %v1178_v23 = vadd.f32 %v1177_v44, %v1078_v8 }
 0x3a4   : > { %1180 = vst.msk [vmem:[#allocation3] sm:$0x1] %vm1179_vm11, %v1178_v23 }
 0x3ab   : > { %v1185_v5 = vld [vmem:[#allocation3] sm:$0x1] }
 0x3ac   : > { %v1186_v43 = vmul.f32 0.5, %v1185_v5 }
 0x3ae   : > { %1187 = vst.msk [vmem:[#allocation9] sm:$0x1] %vm1179_vm11, %v1186_v43 }
 0x3af PF: > { %p1299_p4 = scmp.eq.s32.totalorder %s1678_s13, 2  ;;  %s1643_s15 = smov [#allocation9]  }
 0x3b0   : > { %s1195_s30 = sshll.u32 %s1643_s15, 4  ;;  %s1196_s30 = int_to_ptr.vmem [resolvable:$true] %s1195_s30 }
 0x3b1   : > { %s1567_s3 = scalar_lea.vmem %s1196_s30, 16  ;;  %s1573_s18 = scalar_lea.vmem %s1196_s30, 32 }
 0x3b2   : > { %p1568_p5 = scmp.ne.s32.totalorder %s1196_s30, %s1567_s3  ;;  %p1574_p10 = scmp.lt.s32.totalorder %s1196_s30, %s1196_s30 }
 0x3b3   : > { %p1575_p12 = scmp.lt.s32.totalorder %s1573_s18, %s1567_s3 }
 0x3b4   : > { %p1569_p6 = pnand %p1568_p5, %p1299_p4 }
 0x3b5   : > { %p1576_p0 = por %p1575_p12, %p1574_p10 }
 0x3b6   : > { %p1570_p9 = pneg %p1569_p6 }
 0x3b8   : > { %p1577_p2 = pnand %p1576_p0, %p1570_p9 }
 0x3ba   : > { %1580 = shalt.err (!%p1577_p2)
}
 0x3bb   : > { %s1581_s20 = scalar_lea.hbm %s2289_s2, 16 }
 0x3bc   : > { %p1582_p11 = scmp.ne.s32.totalorder %s2289_s2, %s1581_s20  ;;  %p1587_p7 = scmp.lt.u32.totalorder %s1581_s20, %s2289_s2 }
 0x3be   : > { %p1583_p13 = pnand %p1582_p11, %p1299_p4 }
 0x3c0   : > { %p1584_p3 = pneg %p1583_p13 }
 0x3c2   : > { %p1589_p8 = pnand %p1587_p7, %p1584_p3 }
 0x3c4   : > { %1592 = shalt.err (!%p1589_p8)
}
 0x3c5   : > { %1285 = dma.vmem_to_hbm [thread:$0]  (%p1299_p4), %s1196_s30, 16, %s2289_s2, [#allocation6]  }
 0x3c6   : > { %1618 = dma.done.wait (%p1299_p4), [#allocation6], 16  }
 0x3c7   : > { %1620 = vsyncadd (%p1299_p4), [#allocation6], 4294967280 }
 0x3c8 PF: > { %p14_p1 = scmp.ge.s32.totalorder %s1704_s19, 5   ;;  %s2302_s9 = smov %s1627_s10 }
 0x3c9   : > { %s2303_s10 = smov %s1631_s11  ;;  %s2304_s11 = smov %s1733_s6 }
 0x3ca   : > { %s2305_s12 = smov %s1704_s19  ;;  %16 = sbr.rel (!%p14_p1) target bundleno = 5 (0x5), region = 78 }
 0x3d1   :  { %1208 = vsyncpa [#allocation5], 1 }
 0x3d2   :  { %1210 = vsyncpa [#allocation5 + $0x1], 1 }
 0x3d3   :  { %1211 = vsyncpa [#allocation8], 1 }
 0x3d4   :  { %1213 = vsyncpa [#allocation8 + $0x1], 1 }
 0x3d5   :  { %1214 = vsyncpa [#allocation6], 1 }
 0x3d6   :  { %1216 = vsyncpa [#allocation6 + $0x1], 1 }

</bundles_post_ra>
